<compile_context>
chip_gen: v6e
topology: v6e:2x2x1
jax: 0.10.0
libtpu: 0.0.40
codegen_flags: <defaults>
</compile_context>

<pallas_src>
import functools

import jax
import jax.numpy as jnp
import numpy as np
from jax.experimental import pallas as pl
from jax.experimental.pallas import tpu as pltpu


def _relu(x):
    return jnp.maximum(x, 0.0)


def _round_up(n, m=128):
    return ((n + m - 1) // m) * m


def ocr_kernel(x_ref, p_ref,
               wp1, bp1, wp2, bp2,      # f_pixel   (2 x conv1x1+BNReLU, folded; scale folded in)
               wo1, bo1, wo2, bo2,      # f_object
               wd, bd,                  # f_down
               wu, bu,                  # f_up
               wf_ctx, wf_x, bf,        # conv_bn_dropout (weight split over the concat)
               out_ref,
               k_scr, v_scr,            # persistent per-batch key / value scratch
               *, m_actual):
    f32 = jnp.float32
    bf16 = jnp.bfloat16

    # ---- hoisted proxy-side projections: only at the first HW tile of each batch ----
    @pl.when(pl.program_id(1) == 0)
    def _():
        pblk = p_ref[0]                                                   # (M_pad, Cin_pad) bf16
        k1 = _relu(jnp.dot(pblk, wo1[...], preferred_element_type=f32) + bo1[...])
        k2 = _relu(jnp.dot(k1.astype(bf16), wo2[...], preferred_element_type=f32) + bo2[...])
        vv = _relu(jnp.dot(pblk, wd[...], preferred_element_type=f32) + bd[...])
        k_scr[...] = k2.astype(k_scr.dtype)
        v_scr[...] = vv.astype(v_scr.dtype)

    xb = x_ref[0]                                                          # (tq, Cin_pad) bf16

    # f_pixel(feats) -> query  (tq, K_pad); key_channels^-0.5 already folded into wp2/bp2
    q = _relu(jnp.dot(xb, wp1[...], preferred_element_type=f32) + bp1[...])
    q = _relu(jnp.dot(q.astype(bf16), wp2[...], preferred_element_type=f32) + bp2[...])

    # sim = q @ k^T  over K  -> (tq, M_pad)
    sim = jax.lax.dot_general(q.astype(bf16), k_scr[...],
                              (((1,), (1,)), ((), ())),
                              preferred_element_type=f32)

    # mask padded proxy columns before softmax
    if m_actual < k_scr.shape[0]:
        col = jax.lax.broadcasted_iota(jnp.int32, sim.shape, 1)
        sim = jnp.where(col < m_actual, sim, jnp.float32(-1e30))

    sim = sim - jnp.max(sim, axis=-1, keepdims=True)
    e = jnp.exp(sim)
    denom = jnp.sum(e, axis=-1, keepdims=True)
    probs = e * pl.reciprocal(denom, approx=True)                          # EUP, ~free

    # context = probs @ value -> f_up
    ctx = jnp.dot(probs.astype(bf16), v_scr[...], preferred_element_type=f32)   # (tq, K_pad)
    up = _relu(jnp.dot(ctx.astype(bf16), wu[...], preferred_element_type=f32) + bu[...])  # (tq, Cin_pad)

    # conv_bn_dropout(concat([context, feats])) as a split matmul; dropout = identity
    out = _relu(jnp.dot(up.astype(bf16), wf_ctx[...], preferred_element_type=f32)
                + jnp.dot(xb, wf_x[...], preferred_element_type=f32)
                + bf[...])
    out_ref[0] = out.astype(out_ref.dtype)


def _pick_tq(hw, target):
    """Largest HW tile <= target that divides HW and is a multiple of 8 (or HW itself)."""
    if hw <= target:
        return hw
    if hw % 8 != 0:
        return hw
    t = (min(target, hw) // 8) * 8
    while t > 8 and hw % t != 0:
        t -= 8
    return t if hw % t == 0 else hw


def spatial_ocr_pallas(feats_nchw, proxy_nchw, params, key_channels, out_channels,
                       tq_target=None):
    B, Cin, H, W = feats_nchw.shape
    _, _, Hp, Wp = proxy_nchw.shape
    HW, M = H * W, Hp * Wp

    # --- padded / lane-friendly sizes ---
    Cin_p = _round_up(Cin, 128)
    K_p = _round_up(key_channels, 128)
    Cout_p = _round_up(out_channels, 128)
    M_p = _round_up(M, 128)

    # --- token-major layout + channel/proxy padding; matmul operands in bf16 ---
    x = jnp.transpose(feats_nchw.reshape(B, Cin, HW), (0, 2, 1))           # (B, HW, Cin)
    p = jnp.transpose(proxy_nchw.reshape(B, Cin, M), (0, 2, 1))            # (B, M,  Cin)
    x = jnp.pad(x, ((0, 0), (0, 0), (0, Cin_p - Cin))).astype(jnp.bfloat16)
    p = jnp.pad(p, ((0, 0), (0, M_p - M), (0, Cin_p - Cin))).astype(jnp.bfloat16)

    def pad_w(w, r, c):
        return jnp.pad(w, ((0, r - w.shape[0]), (0, c - w.shape[1])))

    def pad_b(b, c):
        return jnp.pad(b, ((0, 0), (0, c - b.shape[1]))).astype(jnp.float32)

    scale = key_channels ** (-0.5)   # folded into the second f_pixel conv (relu is pos.-homog.)

    wp1 = pad_w(params["wp1"], Cin_p, K_p).astype(jnp.bfloat16)
    bp1 = pad_b(params["bp1"], K_p)
    wp2 = (pad_w(params["wp2"], K_p, K_p) * scale).astype(jnp.bfloat16)
    bp2 = pad_b(params["bp2"], K_p) * scale
    wo1 = pad_w(params["wo1"], Cin_p, K_p).astype(jnp.bfloat16)
    bo1 = pad_b(params["bo1"], K_p)
    wo2 = pad_w(params["wo2"], K_p, K_p).astype(jnp.bfloat16)
    bo2 = pad_b(params["bo2"], K_p)
    wd = pad_w(params["wd"], Cin_p, K_p).astype(jnp.bfloat16)
    bd = pad_b(params["bd"], K_p)
    wu = pad_w(params["wu"], K_p, Cin_p).astype(jnp.bfloat16)
    bu = pad_b(params["bu"], Cin_p)
    wf_ctx = pad_w(params["wf_ctx"], Cin_p, Cout_p).astype(jnp.bfloat16)
    wf_x = pad_w(params["wf_x"], Cin_p, Cout_p).astype(jnp.bfloat16)
    bf = pad_b(params["bf"], Cout_p)

    weights = [wp1, bp1, wp2, bp2, wo1, bo1, wo2, bo2, wd, bd, wu, bu, wf_ctx, wf_x, bf]

    # --- HW tile size: smaller on v7x (64 MiB VMEM) than on v5e/v6e (128 MiB) ---
    if tq_target is None:
        try:
            vmem_cap = int(getattr(pltpu.get_tpu_info(), "vmem_capacity_bytes", 128 << 20))
        except Exception:  # pragma: no cover - conservative fallback
            vmem_cap = 128 << 20
        tq_target = 512 if vmem_cap <= (64 << 20) else 1024
    tq = _pick_tq(HW, tq_target)
    n_tq = HW // tq

    # --- VMEM budget from buffer math (double-buffered blocks + scratch + temporaries) ---
    weight_bytes = sum(int(w.size) * w.dtype.itemsize for w in weights)
    vmem_est = (tq * Cin_p * 2 * 2            # feats tile (bf16) x2 buffers
                + tq * Cout_p * 4 * 2         # output tile (f32) x2 buffers
                + M_p * Cin_p * 2 * 2         # proxy block (bf16) x2 buffers
                + 2 * M_p * K_p * 2           # k/v scratch (bf16)
                + 2 * weight_bytes            # weights (resident, x2 headroom)
                + tq * 4 * (3 * K_p + 3 * M_p + 3 * Cin_p + 2 * Cout_p))  # f32 temporaries
    vmem_limit = int(min(64 << 20, max(32 << 20, int(vmem_est * 1.5))))

    # --- advisory cost estimate for the XLA scheduler ---
    flops_per_b = (HW * 2 * Cin_p * K_p + HW * 2 * K_p * K_p          # query
                   + M_p * 2 * Cin_p * K_p + M_p * 2 * K_p * K_p      # key
                   + M_p * 2 * Cin_p * K_p                            # value
                   + HW * M_p * 2 * K_p                               # sim
                   + HW * K_p * 2 * M_p                               # context
                   + HW * Cin_p * 2 * K_p                             # f_up
                   + HW * Cout_p * 2 * Cin_p * 2)                     # fused output conv
    cost = pl.CostEstimate(
        flops=int(B * flops_per_b),
        transcendentals=int(B * HW * M_p),
        bytes_accessed=int(x.size * 2 + p.size * 2 + weight_bytes + B * HW * Cout_p * 4),
    )

    def full_spec(arr):
        nd = arr.ndim
        return pl.BlockSpec(arr.shape, lambda b, i, _nd=nd: (0,) * _nd)

    in_specs = [pl.BlockSpec((1, tq, Cin_p), lambda b, i: (b, i, 0)),
                pl.BlockSpec((1, M_p, Cin_p), lambda b, i: (b, 0, 0))]
    in_specs += [full_spec(w) for w in weights]

    out = pl.pallas_call(
        functools.partial(ocr_kernel, m_actual=M),
        out_shape=jax.ShapeDtypeStruct((B, HW, Cout_p), jnp.float32),
        grid_spec=pltpu.PrefetchScalarGridSpec(
            num_scalar_prefetch=0,
            grid=(B, n_tq),
            in_specs=in_specs,
            out_specs=pl.BlockSpec((1, tq, Cout_p), lambda b, i: (b, i, 0)),
            scratch_shapes=[pltpu.VMEM((M_p, K_p), jnp.bfloat16),   # key   scratch
                            pltpu.VMEM((M_p, K_p), jnp.bfloat16)],  # value scratch
        ),
        compiler_params=pltpu.CompilerParams(
            # HW axis is "arbitrary": k/v scratch is filled at hw_tile==0 and reused.
            dimension_semantics=("parallel", "arbitrary"),
            vmem_limit_bytes=vmem_limit,
        ),
        cost_estimate=cost,
    )(x, p, *weights)

    out = out[:, :, :out_channels]
    return jnp.transpose(out, (0, 2, 1)).reshape(B, out_channels, H, W)


def _fold_conv_bn(key, c_in, c_out, eps=1e-5):
    """1x1 conv (bias=False) + eval-mode BN folded into (W, b); y = x @ W + b."""
    k1, k2, k3 = jax.random.split(key, 3)
    w = jax.random.normal(k1, (c_in, c_out), jnp.float32) * (1.0 / np.sqrt(c_in))
    gamma = 1.0 + 0.1 * jax.random.normal(k2, (c_out,), jnp.float32)
    beta = 0.1 * jax.random.normal(k3, (c_out,), jnp.float32)
    running_mean = jnp.zeros((c_out,), jnp.float32)
    running_var = jnp.ones((c_out,), jnp.float32)
    scale = gamma / jnp.sqrt(running_var + eps)
    w_fold = w * scale[None, :]
    b_fold = beta - running_mean * scale
    return w_fold, b_fold.reshape(1, c_out)


def make_params(key, in_channels, key_channels, out_channels):
    ks = jax.random.split(key, 8)
    p = {}
    p["wp1"], p["bp1"] = _fold_conv_bn(ks[0], in_channels, key_channels)
    p["wp2"], p["bp2"] = _fold_conv_bn(ks[1], key_channels, key_channels)
    p["wo1"], p["bo1"] = _fold_conv_bn(ks[2], in_channels, key_channels)
    p["wo2"], p["bo2"] = _fold_conv_bn(ks[3], key_channels, key_channels)
    p["wd"], p["bd"] = _fold_conv_bn(ks[4], in_channels, key_channels)
    p["wu"], p["bu"] = _fold_conv_bn(ks[5], key_channels, in_channels)
    wf, bf = _fold_conv_bn(ks[6], 2 * in_channels, out_channels)
    p["wf_ctx"] = wf[:in_channels]   # acts on context
    p["wf_x"] = wf[in_channels:]     # acts on feats
    p["bf"] = bf
    return p


def spatial_ocr_reference(feats_nchw, proxy_nchw, params, key_channels):
    """Pure-JAX f32 reference reproducing the PyTorch forward semantics."""
    B, Cin, H, W = feats_nchw.shape
    _, _, Hp, Wp = proxy_nchw.shape
    x = jnp.transpose(feats_nchw.reshape(B, Cin, H * W), (0, 2, 1))
    p = jnp.transpose(proxy_nchw.reshape(B, Cin, Hp * Wp), (0, 2, 1))

    r = lambda z: jnp.maximum(z, 0.0)
    q = r(r(x @ params["wp1"] + params["bp1"]) @ params["wp2"] + params["bp2"])
    k = r(r(p @ params["wo1"] + params["bo1"]) @ params["wo2"] + params["bo2"])
    v = r(p @ params["wd"] + params["bd"])
    sim = jnp.einsum("bqc,bkc->bqk", q, k) * (key_channels ** -0.5)
    sim = jax.nn.softmax(sim, axis=-1)
    ctx = sim @ v
    up = r(ctx @ params["wu"] + params["bu"])
    out = r(up @ params["wf_ctx"] + x @ params["wf_x"] + params["bf"])
    Cout = out.shape[-1]
    return jnp.transpose(out, (0, 2, 1)).reshape(B, Cout, H, W)


if __name__ == "__main__":
    # Small shapes consistent with the module:
    #   feats: N x C x H x W, proxy: N x C x M x 1 (object regions)
    B, C_IN, KEY_C, OUT_C = 2, 32, 16, 32
    H = W = 8
    N_PROXY = 8

    root = jax.random.PRNGKey(0)
    k_feat, k_proxy, k_param = jax.random.split(root, 3)
    feats = jax.random.normal(k_feat, (B, C_IN, H, W), jnp.float32)
    proxy = jax.random.normal(k_proxy, (B, C_IN, N_PROXY, 1), jnp.float32)
    params = make_params(k_param, C_IN, KEY_C, OUT_C)

    out = spatial_ocr_pallas(feats, proxy, params, KEY_C, OUT_C)
    out = jax.block_until_ready(out)

    ref = jax.block_until_ready(spatial_ocr_reference(feats, proxy, params, KEY_C))
    assert out.shape == (B, OUT_C, H, W), out.shape
    # bf16 matmul inputs + approx softmax reciprocal => slightly looser tolerance vs f32 ref.
    np.testing.assert_allclose(np.asarray(out), np.asarray(ref), rtol=5e-2, atol=5e-2)

    print("KERNEL_OK")
</pallas_src>

<mosaic_0001>
module attributes {stable_mosaic.version = 11 : i64} {
  func.func @ocr_kernel(%arg0: i32, %arg1: i32, %arg2: memref<1x64x128xbf16, #tpu.memory_space<vmem>>, %arg3: memref<1x128x128xbf16, #tpu.memory_space<vmem>>, %arg4: memref<128x128xbf16, #tpu.memory_space<vmem>>, %arg5: memref<1x128xf32, #tpu.memory_space<vmem>>, %arg6: memref<128x128xbf16, #tpu.memory_space<vmem>>, %arg7: memref<1x128xf32, #tpu.memory_space<vmem>>, %arg8: memref<128x128xbf16, #tpu.memory_space<vmem>>, %arg9: memref<1x128xf32, #tpu.memory_space<vmem>>, %arg10: memref<128x128xbf16, #tpu.memory_space<vmem>>, %arg11: memref<1x128xf32, #tpu.memory_space<vmem>>, %arg12: memref<128x128xbf16, #tpu.memory_space<vmem>>, %arg13: memref<1x128xf32, #tpu.memory_space<vmem>>, %arg14: memref<128x128xbf16, #tpu.memory_space<vmem>>, %arg15: memref<1x128xf32, #tpu.memory_space<vmem>>, %arg16: memref<128x128xbf16, #tpu.memory_space<vmem>>, %arg17: memref<128x128xbf16, #tpu.memory_space<vmem>>, %arg18: memref<1x128xf32, #tpu.memory_space<vmem>>, %arg19: memref<1x64x128xf32, #tpu.memory_space<vmem>>, %arg20: memref<128x128xbf16, #tpu.memory_space<vmem>>, %arg21: memref<128x128xbf16, #tpu.memory_space<vmem>>) attributes {dimension_semantics = [#tpu.dimension_semantics<parallel>, #tpu.dimension_semantics<arbitrary>], iteration_bounds = array<i64: 2, 1>, scalar_prefetch = 0 : i64, scratch_operands = 2 : i64, tpu.core_type = #tpu.core_type<tc>, window_params = [{transform_indices = @transform_0, window_bounds = array<i64: 1, 64, 128>}, {transform_indices = @transform_1, window_bounds = array<i64: 1, 128, 128>}, {pipeline_mode = #tpu.pipeline_mode<synchronous>, transform_indices = @transform_2, window_bounds = array<i64: 128, 128>}, {pipeline_mode = #tpu.pipeline_mode<synchronous>, transform_indices = @transform_3, window_bounds = array<i64: 1, 128>}, {pipeline_mode = #tpu.pipeline_mode<synchronous>, transform_indices = @transform_4, window_bounds = array<i64: 128, 128>}, {pipeline_mode = #tpu.pipeline_mode<synchronous>, transform_indices = @transform_5, window_bounds = array<i64: 1, 128>}, {pipeline_mode = #tpu.pipeline_mode<synchronous>, transform_indices = @transform_6, window_bounds = array<i64: 128, 128>}, {pipeline_mode = #tpu.pipeline_mode<synchronous>, transform_indices = @transform_7, window_bounds = array<i64: 1, 128>}, {pipeline_mode = #tpu.pipeline_mode<synchronous>, transform_indices = @transform_8, window_bounds = array<i64: 128, 128>}, {pipeline_mode = #tpu.pipeline_mode<synchronous>, transform_indices = @transform_9, window_bounds = array<i64: 1, 128>}, {pipeline_mode = #tpu.pipeline_mode<synchronous>, transform_indices = @transform_10, window_bounds = array<i64: 128, 128>}, {pipeline_mode = #tpu.pipeline_mode<synchronous>, transform_indices = @transform_11, window_bounds = array<i64: 1, 128>}, {pipeline_mode = #tpu.pipeline_mode<synchronous>, transform_indices = @transform_12, window_bounds = array<i64: 128, 128>}, {pipeline_mode = #tpu.pipeline_mode<synchronous>, transform_indices = @transform_13, window_bounds = array<i64: 1, 128>}, {pipeline_mode = #tpu.pipeline_mode<synchronous>, transform_indices = @transform_14, window_bounds = array<i64: 128, 128>}, {pipeline_mode = #tpu.pipeline_mode<synchronous>, transform_indices = @transform_15, window_bounds = array<i64: 128, 128>}, {pipeline_mode = #tpu.pipeline_mode<synchronous>, transform_indices = @transform_16, window_bounds = array<i64: 1, 128>}, {transform_indices = @transform_17, window_bounds = array<i64: 1, 64, 128>}]} {
    %c0_i32 = arith.constant 0 : i32
    %0 = arith.cmpi eq, %arg1, %c0_i32 : i32
    %1 = arith.extui %0 : i1 to i32
    %c0_i32_0 = arith.constant 0 : i32
    %2 = arith.cmpi ne, %1, %c0_i32_0 : i32
    scf.if %2 {
      %c0_41 = arith.constant 0 : index
      %c0_42 = arith.constant 0 : index
      %c0_43 = arith.constant 0 : index
      %63 = vector.load %arg3[%c0_41, %c0_42, %c0_43] : memref<1x128x128xbf16, #tpu.memory_space<vmem>>, vector<1x128x128xbf16>
      %64 = vector.shape_cast %63 : vector<1x128x128xbf16> to vector<128x128xbf16>
      %c0_44 = arith.constant 0 : index
      %c0_45 = arith.constant 0 : index
      %65 = vector.load %arg8[%c0_44, %c0_45] : memref<128x128xbf16, #tpu.memory_space<vmem>>, vector<128x128xbf16>
      %cst_46 = arith.constant dense<0.000000e+00> : vector<128x128xf32>
      %66 = tpu.matmul %64, %65, %cst_46 {dimension_numbers = #tpu.dot_dimension_numbers<[1], [0], [0], [1], [0, 0, 1, 1], [], []>} : vector<128x128xbf16>, vector<128x128xbf16>, vector<128x128xf32> -> vector<128x128xf32>
      %c0_47 = arith.constant 0 : index
      %c0_48 = arith.constant 0 : index
      %67 = vector.load %arg9[%c0_47, %c0_48] : memref<1x128xf32, #tpu.memory_space<vmem>>, vector<1x128xf32>
      %68 = vector.broadcast %67 : vector<1x128xf32> to vector<128x128xf32>
      %69 = arith.addf %66, %68 : vector<128x128xf32>
      %cst_49 = arith.constant 0.000000e+00 : f32
      %70 = vector.broadcast %cst_49 : f32 to vector<128x128xf32>
      %71 = arith.maximumf %69, %70 : vector<128x128xf32>
      %72 = arith.truncf %71 : vector<128x128xf32> to vector<128x128xbf16>
      %c0_50 = arith.constant 0 : index
      %c0_51 = arith.constant 0 : index
      %73 = vector.load %arg10[%c0_50, %c0_51] : memref<128x128xbf16, #tpu.memory_space<vmem>>, vector<128x128xbf16>
      %cst_52 = arith.constant dense<0.000000e+00> : vector<128x128xf32>
      %74 = tpu.matmul %72, %73, %cst_52 {dimension_numbers = #tpu.dot_dimension_numbers<[1], [0], [0], [1], [0, 0, 1, 1], [], []>} : vector<128x128xbf16>, vector<128x128xbf16>, vector<128x128xf32> -> vector<128x128xf32>
      %c0_53 = arith.constant 0 : index
      %c0_54 = arith.constant 0 : index
      %75 = vector.load %arg11[%c0_53, %c0_54] : memref<1x128xf32, #tpu.memory_space<vmem>>, vector<1x128xf32>
      %76 = vector.broadcast %75 : vector<1x128xf32> to vector<128x128xf32>
      %77 = arith.addf %74, %76 : vector<128x128xf32>
      %cst_55 = arith.constant 0.000000e+00 : f32
      %78 = vector.broadcast %cst_55 : f32 to vector<128x128xf32>
      %79 = arith.maximumf %77, %78 : vector<128x128xf32>
      %c0_56 = arith.constant 0 : index
      %c0_57 = arith.constant 0 : index
      %80 = vector.load %arg12[%c0_56, %c0_57] : memref<128x128xbf16, #tpu.memory_space<vmem>>, vector<128x128xbf16>
      %cst_58 = arith.constant dense<0.000000e+00> : vector<128x128xf32>
      %81 = tpu.matmul %64, %80, %cst_58 {dimension_numbers = #tpu.dot_dimension_numbers<[1], [0], [0], [1], [0, 0, 1, 1], [], []>} : vector<128x128xbf16>, vector<128x128xbf16>, vector<128x128xf32> -> vector<128x128xf32>
      %c0_59 = arith.constant 0 : index
      %c0_60 = arith.constant 0 : index
      %82 = vector.load %arg13[%c0_59, %c0_60] : memref<1x128xf32, #tpu.memory_space<vmem>>, vector<1x128xf32>
      %83 = vector.broadcast %82 : vector<1x128xf32> to vector<128x128xf32>
      %84 = arith.addf %81, %83 : vector<128x128xf32>
      %cst_61 = arith.constant 0.000000e+00 : f32
      %85 = vector.broadcast %cst_61 : f32 to vector<128x128xf32>
      %86 = arith.maximumf %84, %85 : vector<128x128xf32>
      %87 = arith.truncf %79 : vector<128x128xf32> to vector<128x128xbf16>
      %c0_62 = arith.constant 0 : index
      %c0_63 = arith.constant 0 : index
      %88 = vector.load %arg20[%c0_62, %c0_63] : memref<128x128xbf16, #tpu.memory_space<vmem>>, vector<128x128xbf16>
      tpu.vector_store %arg20[%c0_62, %c0_63], %87 {strides = array<i32>} : memref<128x128xbf16, #tpu.memory_space<vmem>>, vector<128x128xbf16>,
      %89 = arith.truncf %86 : vector<128x128xf32> to vector<128x128xbf16>
      %c0_64 = arith.constant 0 : index
      %c0_65 = arith.constant 0 : index
      %90 = vector.load %arg21[%c0_64, %c0_65] : memref<128x128xbf16, #tpu.memory_space<vmem>>, vector<128x128xbf16>
      tpu.vector_store %arg21[%c0_64, %c0_65], %89 {strides = array<i32>} : memref<128x128xbf16, #tpu.memory_space<vmem>>, vector<128x128xbf16>,
    } else {
    }
    %c0 = arith.constant 0 : index
    %c0_1 = arith.constant 0 : index
    %c0_2 = arith.constant 0 : index
    %3 = vector.load %arg2[%c0, %c0_1, %c0_2] : memref<1x64x128xbf16, #tpu.memory_space<vmem>>, vector<1x64x128xbf16>
    %4 = vector.shape_cast %3 : vector<1x64x128xbf16> to vector<64x128xbf16>
    %c0_3 = arith.constant 0 : index
    %c0_4 = arith.constant 0 : index
    %5 = vector.load %arg4[%c0_3, %c0_4] : memref<128x128xbf16, #tpu.memory_space<vmem>>, vector<128x128xbf16>
    %cst = arith.constant dense<0.000000e+00> : vector<64x128xf32>
    %6 = tpu.matmul %4, %5, %cst {dimension_numbers = #tpu.dot_dimension_numbers<[1], [0], [0], [1], [0, 0, 1, 1], [], []>} : vector<64x128xbf16>, vector<128x128xbf16>, vector<64x128xf32> -> vector<64x128xf32>
    %c0_5 = arith.constant 0 : index
    %c0_6 = arith.constant 0 : index
    %7 = vector.load %arg5[%c0_5, %c0_6] : memref<1x128xf32, #tpu.memory_space<vmem>>, vector<1x128xf32>
    %8 = vector.broadcast %7 : vector<1x128xf32> to vector<64x128xf32>
    %9 = arith.addf %6, %8 : vector<64x128xf32>
    %cst_7 = arith.constant 0.000000e+00 : f32
    %10 = vector.broadcast %cst_7 : f32 to vector<64x128xf32>
    %11 = arith.maximumf %9, %10 : vector<64x128xf32>
    %12 = arith.truncf %11 : vector<64x128xf32> to vector<64x128xbf16>
    %c0_8 = arith.constant 0 : index
    %c0_9 = arith.constant 0 : index
    %13 = vector.load %arg6[%c0_8, %c0_9] : memref<128x128xbf16, #tpu.memory_space<vmem>>, vector<128x128xbf16>
    %cst_10 = arith.constant dense<0.000000e+00> : vector<64x128xf32>
    %14 = tpu.matmul %12, %13, %cst_10 {dimension_numbers = #tpu.dot_dimension_numbers<[1], [0], [0], [1], [0, 0, 1, 1], [], []>} : vector<64x128xbf16>, vector<128x128xbf16>, vector<64x128xf32> -> vector<64x128xf32>
    %c0_11 = arith.constant 0 : index
    %c0_12 = arith.constant 0 : index
    %15 = vector.load %arg7[%c0_11, %c0_12] : memref<1x128xf32, #tpu.memory_space<vmem>>, vector<1x128xf32>
    %16 = vector.broadcast %15 : vector<1x128xf32> to vector<64x128xf32>
    %17 = arith.addf %14, %16 : vector<64x128xf32>
    %cst_13 = arith.constant 0.000000e+00 : f32
    %18 = vector.broadcast %cst_13 : f32 to vector<64x128xf32>
    %19 = arith.maximumf %17, %18 : vector<64x128xf32>
    %20 = arith.truncf %19 : vector<64x128xf32> to vector<64x128xbf16>
    %c0_14 = arith.constant 0 : index
    %c0_15 = arith.constant 0 : index
    %21 = vector.load %arg20[%c0_14, %c0_15] : memref<128x128xbf16, #tpu.memory_space<vmem>>, vector<128x128xbf16>
    %cst_16 = arith.constant dense<0.000000e+00> : vector<64x128xf32>
    %22 = tpu.matmul %20, %21, %cst_16 {dimension_numbers = #tpu.dot_dimension_numbers<[1], [1], [0], [0], [0, 0, 1, 0], [], []>} : vector<64x128xbf16>, vector<128x128xbf16>, vector<64x128xf32> -> vector<64x128xf32>
    %23 = tpu.iota {dimensions = array<i32: 1>} : vector<64x128xi32>
    %c8_i32 = arith.constant 8 : i32
    %24 = vector.broadcast %c8_i32 : i32 to vector<64x128xi32>
    %25 = arith.cmpi slt, %23, %24 : vector<64x128xi32>
    %cst_17 = arith.constant -1.000000e+30 : f32
    %26 = vector.broadcast %cst_17 : f32 to vector<64x128xf32>
    %27 = arith.select %25, %22, %26 : vector<64x128xi1>, vector<64x128xf32>
    %cst_18 = arith.constant dense<0xFF800000> : vector<64xf32>
    %28 = vector.multi_reduction <maximumf>, %27, %cst_18 [1] : vector<64x128xf32> to vector<64xf32>
    %29 = vector.shape_cast %28 : vector<64xf32> to vector<64x1xf32>
    %30 = vector.broadcast %29 : vector<64x1xf32> to vector<64x128xf32>
    %31 = arith.subf %27, %30 : vector<64x128xf32>
    %32 = math.exp %31 : vector<64x128xf32>
    %cst_19 = arith.constant dense<0.000000e+00> : vector<64xf32>
    %33 = vector.multi_reduction <add>, %32, %cst_19 [1] : vector<64x128xf32> to vector<64xf32>
    %34 = vector.shape_cast %33 : vector<64xf32> to vector<64x1xf32>
    %35 = tpu.reciprocal %34 {approx = true} : vector<64x1xf32> -> vector<64x1xf32>
    %36 = vector.broadcast %35 : vector<64x1xf32> to vector<64x128xf32>
    %37 = arith.mulf %32, %36 : vector<64x128xf32>
    %38 = arith.truncf %37 : vector<64x128xf32> to vector<64x128xbf16>
    %c0_20 = arith.constant 0 : index
    %c0_21 = arith.constant 0 : index
    %39 = vector.load %arg21[%c0_20, %c0_21] : memref<128x128xbf16, #tpu.memory_space<vmem>>, vector<128x128xbf16>
    %cst_22 = arith.constant dense<0.000000e+00> : vector<64x128xf32>
    %40 = tpu.matmul %38, %39, %cst_22 {dimension_numbers = #tpu.dot_dimension_numbers<[1], [0], [0], [1], [0, 0, 1, 1], [], []>} : vector<64x128xbf16>, vector<128x128xbf16>, vector<64x128xf32> -> vector<64x128xf32>
    %41 = arith.truncf %40 : vector<64x128xf32> to vector<64x128xbf16>
    %c0_23 = arith.constant 0 : index
    %c0_24 = arith.constant 0 : index
    %42 = vector.load %arg14[%c0_23, %c0_24] : memref<128x128xbf16, #tpu.memory_space<vmem>>, vector<128x128xbf16>
    %cst_25 = arith.constant dense<0.000000e+00> : vector<64x128xf32>
    %43 = tpu.matmul %41, %42, %cst_25 {dimension_numbers = #tpu.dot_dimension_numbers<[1], [0], [0], [1], [0, 0, 1, 1], [], []>} : vector<64x128xbf16>, vector<128x128xbf16>, vector<64x128xf32> -> vector<64x128xf32>
    %c0_26 = arith.constant 0 : index
    %c0_27 = arith.constant 0 : index
    %44 = vector.load %arg15[%c0_26, %c0_27] : memref<1x128xf32, #tpu.memory_space<vmem>>, vector<1x128xf32>
    %45 = vector.broadcast %44 : vector<1x128xf32> to vector<64x128xf32>
    %46 = arith.addf %43, %45 : vector<64x128xf32>
    %cst_28 = arith.constant 0.000000e+00 : f32
    %47 = vector.broadcast %cst_28 : f32 to vector<64x128xf32>
    %48 = arith.maximumf %46, %47 : vector<64x128xf32>
    %49 = arith.truncf %48 : vector<64x128xf32> to vector<64x128xbf16>
    %c0_29 = arith.constant 0 : index
    %c0_30 = arith.constant 0 : index
    %50 = vector.load %arg16[%c0_29, %c0_30] : memref<128x128xbf16, #tpu.memory_space<vmem>>, vector<128x128xbf16>
    %cst_31 = arith.constant dense<0.000000e+00> : vector<64x128xf32>
    %51 = tpu.matmul %49, %50, %cst_31 {dimension_numbers = #tpu.dot_dimension_numbers<[1], [0], [0], [1], [0, 0, 1, 1], [], []>} : vector<64x128xbf16>, vector<128x128xbf16>, vector<64x128xf32> -> vector<64x128xf32>
    %c0_32 = arith.constant 0 : index
    %c0_33 = arith.constant 0 : index
    %52 = vector.load %arg17[%c0_32, %c0_33] : memref<128x128xbf16, #tpu.memory_space<vmem>>, vector<128x128xbf16>
    %cst_34 = arith.constant dense<0.000000e+00> : vector<64x128xf32>
    %53 = tpu.matmul %4, %52, %cst_34 {dimension_numbers = #tpu.dot_dimension_numbers<[1], [0], [0], [1], [0, 0, 1, 1], [], []>} : vector<64x128xbf16>, vector<128x128xbf16>, vector<64x128xf32> -> vector<64x128xf32>
    %54 = arith.addf %51, %53 : vector<64x128xf32>
    %c0_35 = arith.constant 0 : index
    %c0_36 = arith.constant 0 : index
    %55 = vector.load %arg18[%c0_35, %c0_36] : memref<1x128xf32, #tpu.memory_space<vmem>>, vector<1x128xf32>
    %56 = vector.broadcast %55 : vector<1x128xf32> to vector<64x128xf32>
    %57 = arith.addf %54, %56 : vector<64x128xf32>
    %cst_37 = arith.constant 0.000000e+00 : f32
    %58 = vector.broadcast %cst_37 : f32 to vector<64x128xf32>
    %59 = arith.maximumf %57, %58 : vector<64x128xf32>
    %c0_38 = arith.constant 0 : index
    %c0_39 = arith.constant 0 : index
    %c0_40 = arith.constant 0 : index
    %60 = vector.load %arg19[%c0_38, %c0_39, %c0_40] : memref<1x64x128xf32, #tpu.memory_space<vmem>>, vector<1x64x128xf32>
    %61 = vector.shape_cast %60 : vector<1x64x128xf32> to vector<64x128xf32>
    %62 = vector.shape_cast %59 : vector<64x128xf32> to vector<1x64x128xf32>
    tpu.vector_store %arg19[%c0_38, %c0_39, %c0_40], %62 {strides = array<i32>} : memref<1x64x128xf32, #tpu.memory_space<vmem>>, vector<1x64x128xf32>,
    return
  }
  func.func @transform_0(%arg0: i32, %arg1: i32) -> (i32, i32, i32) {
    %c0_i32 = arith.constant 0 : i32
    %c0_i32_0 = arith.constant 0 : i32
    return %arg0, %arg1, %c0_i32 : i32, i32, i32
  }
  func.func @transform_1(%arg0: i32, %arg1: i32) -> (i32, i32, i32) {
    %c0_i32 = arith.constant 0 : i32
    %c0_i32_0 = arith.constant 0 : i32
    %c0_i32_1 = arith.constant 0 : i32
    return %arg0, %c0_i32, %c0_i32_0 : i32, i32, i32
  }
  func.func @transform_2(%arg0: i32, %arg1: i32) -> (i32, i32) {
    %c0_i32 = arith.constant 0 : i32
    %c0_i32_0 = arith.constant 0 : i32
    %c0_i32_1 = arith.constant 0 : i32
    return %c0_i32, %c0_i32_0 : i32, i32
  }
  func.func @transform_3(%arg0: i32, %arg1: i32) -> (i32, i32) {
    %c0_i32 = arith.constant 0 : i32
    %c0_i32_0 = arith.constant 0 : i32
    %c0_i32_1 = arith.constant 0 : i32
    return %c0_i32, %c0_i32_0 : i32, i32
  }
  func.func @transform_4(%arg0: i32, %arg1: i32) -> (i32, i32) {
    %c0_i32 = arith.constant 0 : i32
    %c0_i32_0 = arith.constant 0 : i32
    %c0_i32_1 = arith.constant 0 : i32
    return %c0_i32, %c0_i32_0 : i32, i32
  }
  func.func @transform_5(%arg0: i32, %arg1: i32) -> (i32, i32) {
    %c0_i32 = arith.constant 0 : i32
    %c0_i32_0 = arith.constant 0 : i32
    %c0_i32_1 = arith.constant 0 : i32
    return %c0_i32, %c0_i32_0 : i32, i32
  }
  func.func @transform_6(%arg0: i32, %arg1: i32) -> (i32, i32) {
    %c0_i32 = arith.constant 0 : i32
    %c0_i32_0 = arith.constant 0 : i32
    %c0_i32_1 = arith.constant 0 : i32
    return %c0_i32, %c0_i32_0 : i32, i32
  }
  func.func @transform_7(%arg0: i32, %arg1: i32) -> (i32, i32) {
    %c0_i32 = arith.constant 0 : i32
    %c0_i32_0 = arith.constant 0 : i32
    %c0_i32_1 = arith.constant 0 : i32
    return %c0_i32, %c0_i32_0 : i32, i32
  }
  func.func @transform_8(%arg0: i32, %arg1: i32) -> (i32, i32) {
    %c0_i32 = arith.constant 0 : i32
    %c0_i32_0 = arith.constant 0 : i32
    %c0_i32_1 = arith.constant 0 : i32
    return %c0_i32, %c0_i32_0 : i32, i32
  }
  func.func @transform_9(%arg0: i32, %arg1: i32) -> (i32, i32) {
    %c0_i32 = arith.constant 0 : i32
    %c0_i32_0 = arith.constant 0 : i32
    %c0_i32_1 = arith.constant 0 : i32
    return %c0_i32, %c0_i32_0 : i32, i32
  }
  func.func @transform_10(%arg0: i32, %arg1: i32) -> (i32, i32) {
    %c0_i32 = arith.constant 0 : i32
    %c0_i32_0 = arith.constant 0 : i32
    %c0_i32_1 = arith.constant 0 : i32
    return %c0_i32, %c0_i32_0 : i32, i32
  }
  func.func @transform_11(%arg0: i32, %arg1: i32) -> (i32, i32) {
    %c0_i32 = arith.constant 0 : i32
    %c0_i32_0 = arith.constant 0 : i32
    %c0_i32_1 = arith.constant 0 : i32
    return %c0_i32, %c0_i32_0 : i32, i32
  }
  func.func @transform_12(%arg0: i32, %arg1: i32) -> (i32, i32) {
    %c0_i32 = arith.constant 0 : i32
    %c0_i32_0 = arith.constant 0 : i32
    %c0_i32_1 = arith.constant 0 : i32
    return %c0_i32, %c0_i32_0 : i32, i32
  }
  func.func @transform_13(%arg0: i32, %arg1: i32) -> (i32, i32) {
    %c0_i32 = arith.constant 0 : i32
    %c0_i32_0 = arith.constant 0 : i32
    %c0_i32_1 = arith.constant 0 : i32
    return %c0_i32, %c0_i32_0 : i32, i32
  }
  func.func @transform_14(%arg0: i32, %arg1: i32) -> (i32, i32) {
    %c0_i32 = arith.constant 0 : i32
    %c0_i32_0 = arith.constant 0 : i32
    %c0_i32_1 = arith.constant 0 : i32
    return %c0_i32, %c0_i32_0 : i32, i32
  }
  func.func @transform_15(%arg0: i32, %arg1: i32) -> (i32, i32) {
    %c0_i32 = arith.constant 0 : i32
    %c0_i32_0 = arith.constant 0 : i32
    %c0_i32_1 = arith.constant 0 : i32
    return %c0_i32, %c0_i32_0 : i32, i32
  }
  func.func @transform_16(%arg0: i32, %arg1: i32) -> (i32, i32) {
    %c0_i32 = arith.constant 0 : i32
    %c0_i32_0 = arith.constant 0 : i32
    %c0_i32_1 = arith.constant 0 : i32
    return %c0_i32, %c0_i32_0 : i32, i32
  }
  func.func @transform_17(%arg0: i32, %arg1: i32) -> (i32, i32, i32) {
    %c0_i32 = arith.constant 0 : i32
    %c0_i32_0 = arith.constant 0 : i32
    return %arg0, %arg1, %c0_i32 : i32, i32, i32
  }
}

</mosaic_0001>

<bundles_post_ra>
// kernel: tpu_custom_call.1
= control target key start
LH: loop header
LB: loop body
LE: loop exit
PB: predicated region body
PF: predicated region fallthrough
CT: control target
= control target key end

     0   :  { %s4740_s0 = inlined_call_operand.hbm [shape: bf16[2,64,128], index: 0, kind: input, shape index: {}]   ;;  %s4741_s1 = inlined_call_operand.hbm [shape: bf16[2,128,128], index: 1, kind: input, shape index: {}]   ;;  %s4742_s2 = inlined_call_operand.hbm [shape: bf16[128,128], index: 2, kind: input, shape index: {}]   ;;  %s4743_s3 = inlined_call_operand.vmem [shape: f32[1,128], index: 3, kind: input, shape index: {}]   ;;  %s4744_s4 = inlined_call_operand.hbm [shape: bf16[128,128], index: 4, kind: input, shape index: {}]   ;;  %s4745_s5 = inlined_call_operand.vmem [shape: f32[1,128], index: 5, kind: input, shape index: {}]   ;;  %s4746_s6 = inlined_call_operand.hbm [shape: bf16[128,128], index: 6, kind: input, shape index: {}]   ;;  %s4747_s7 = inlined_call_operand.vmem [shape: f32[1,128], index: 7, kind: input, shape index: {}]   ;;  %s4748_s8 = inlined_call_operand.hbm [shape: bf16[128,128], index: 8, kind: input, shape index: {}]   ;;  %s4749_s9 = inlined_call_operand.vmem [shape: f32[1,128], index: 9, kind: input, shape index: {}]   ;;  %s4750_s10 = inlined_call_operand.hbm [shape: bf16[128,128], index: 10, kind: input, shape index: {}]   ;;  %s4751_s11 = inlined_call_operand.vmem [shape: f32[1,128], index: 11, kind: input, shape index: {}]   ;;  %s4752_s12 = inlined_call_operand.hbm [shape: bf16[128,128], index: 12, kind: input, shape index: {}]   ;;  %s4753_s13 = inlined_call_operand.vmem [shape: f32[1,128], index: 13, kind: input, shape index: {}]   ;;  %s4754_s14 = inlined_call_operand.hbm [shape: bf16[128,128], index: 14, kind: input, shape index: {}]   ;;  %s4755_s15 = inlined_call_operand.hbm [shape: bf16[128,128], index: 15, kind: input, shape index: {}]   ;;  %s4756_s16 = inlined_call_operand.vmem [shape: f32[1,128], index: 16, kind: input, shape index: {}]   ;;  %s4757_s17 = inlined_call_operand.hbm [shape: f32[2,64,128], index: 17, kind: output, shape index: {}]  }
   0x1   :  { %4768 = sst [smem:[#allocation36_spill]] %s4740_s0 }
   0x2   :  { %4769 = sst [smem:[#allocation37_spill]] %s4741_s1 }
   0x3   :  { %4770 = sst [smem:[#allocation38_spill]] %s4742_s2 }
   0x4   :  { %4771 = sst [smem:[#allocation39_spill]] %s4744_s4 }
   0x5   :  { %4772 = sst [smem:[#allocation40_spill]] %s4745_s5 }
   0x6   :  { %4773 = sst [smem:[#allocation41_spill]] %s4746_s6 }
   0x7   :  { %4774 = sst [smem:[#allocation42_spill]] %s4748_s8 }
   0x8   :  { %4775 = sst [smem:[#allocation43_spill]] %s4750_s10 }
   0x9   :  { %4776 = sst [smem:[#allocation44_spill]] %s4752_s12 }
   0xa   :  { %4777 = sst [smem:[#allocation45_spill]] %s4753_s13 }
   0xb   :  { %4778 = sst [smem:[#allocation46_spill]] %s4754_s14 }
   0xc   :  { %4779 = sst [smem:[#allocation47_spill]] %s4755_s15 }
   0xd   :  { %4780 = sst [smem:[#allocation48_spill]] %s4756_s16 }
   0xe   :  { %4781 = sst [smem:[#allocation49_spill]] %s4757_s17 }
   0xf   :  { %22 = vsyncpa [#allocation5], 0 }
  0x10   :  { %24 = vsyncpa [#allocation5 + $0x1], 0 }
  0x11   :  { %25 = vsyncpa [#allocation8], 0 }
  0x12   :  { %27 = vsyncpa [#allocation8 + $0x1], 0 }
  0x13   :  { %28 = vsyncpa [#allocation11], 0 }
  0x14   :  { %29 = vsyncpa [#allocation14], 0 }
  0x15   :  { %30 = vsyncpa [#allocation17], 0 }
  0x16   :  { %31 = vsyncpa [#allocation20], 0 }
  0x17   :  { %32 = vsyncpa [#allocation6], 0 }
  0x18   :  { %34 = vsyncpa [#allocation6 + $0x1], 0  ;;  %s4306_s24 = smov 0   ;;  %s4308_s25 = smov 0  }
  0x19   :  { %s4310_s26 = smov 0   ;;  %s4312_s27 = smov 0  }
  0x1a   :  { %s4314_s28 = smov 0   ;;  %s4316_s29 = smov 0  }
  0x1b LB: > { %4782 = sst [smem:[#allocation30_spill]] %s4187_s26  ;;  %s4337_s0 = sadd.s32 4294967295, %s4199_s29   ;;  %s4199_s29 = sphi %s4316_s29, %s40_s29   ;;  %s4195_s28 = sphi %s4314_s28, %s4823_s28   ;;  %s4191_s27 = sphi %s4312_s27, %s4822_s27   ;;  %s4187_s26 = sphi %s4310_s26, %s4818_s26   ;;  %s4183_s25 = sphi %s4308_s25, %s4821_s25   ;;  %s4179_s24 = sphi %s4306_s24, %s4820_s24  }
  0x1c   : > { %4783 = sst [smem:[#allocation31_spill]] %s4191_s27  ;;  %p2850_p0 = scmp.ge.s32.totalorder %s4199_s29, 1 }
  0x1d   : > { %4784 = sst [smem:[#allocation32_spill]] %s4199_s29  ;;  %p75_p1 = scmp.eq.s32.totalorder %s4337_s0, 0 }
  0x1e   : > { %p454_p2 = scmp.lt.s32.totalorder %s4199_s29, 3  ;;  %s4201_s18 = smov [#allocation9]  }
  0x1f   : > { %s466_s19 = sshll.u32 %s4201_s18, 4  ;;  %s4202_s20 = smov [#allocation10]   ;;  %s467_s19 = int_to_ptr.vmem [resolvable:$true] %s466_s19 }
  0x20   : > { %p4342_p3 = pnand %p2850_p0, %p454_p2  ;;  %s482_s21 = sshll.u32 %s4202_s20, 4  ;;  %s483_s21 = int_to_ptr.vmem [resolvable:$true] %s482_s21 }
  0x21   : > { %s4203_s22 = smov [#allocation13]   ;;  %s3842_s18 = scalar_lea.vmem %s467_s19, 1024 }
  0x22   : > { %p3593_p4 = pneg %p4342_p3  ;;  %s514_s23 = sshll.u32 %s4203_s22, 4  ;;  %s515_s23 = int_to_ptr.vmem [resolvable:$true] %s514_s23 }
  0x23   : > { %p3843_p8 = scmp.ne.s32.totalorder %s467_s19, %s3842_s18  ;;  %p3850_p11 = scmp.lt.s32.totalorder %s467_s19, %s467_s19 }
  0x24   : > { %p4351_p6 = pnand %p3593_p4, %p75_p1  ;;  %p3851_p12 = scmp.lt.s32.totalorder %s3842_s18, %s3842_s18 }
  0x26   : > { %p4357_p7 = pneg %p4351_p6  ;;  %p3852_p13 = por %p3851_p12, %p3850_p11 }
  0x28   : > { %p3845_p9 = pnand %p3843_p8, %p4357_p7 }
  0x2a   : > { %p3846_p10 = pneg %p3845_p9 }
  0x2c   : > { %p3853_p0 = pnand %p3852_p13, %p3846_p10 }
  0x2e   : > { %3856 = shalt.err (!%p3853_p0)
}
  0x2f   : > { %s4759_s20 = smov 64   ;;  %s4761_s22 = smov 4  }
  0x30   : > { %s4788_s2 = sld [smem:[#allocation38_spill]]  ;;  %s3868_s13 = scalar_lea.vmem %s483_s21, 1024 }
  0x31   : > { %p3869_p2 = scmp.ne.s32.totalorder %s483_s21, %s3868_s13  ;;  %p3876_p9 = scmp.lt.s32.totalorder %s483_s21, %s483_s21 }
  0x32   : > { %p3877_p10 = scmp.lt.s32.totalorder %s3868_s13, %s3868_s13 }
  0x33   : > { %p3871_p4 = pnand %p3869_p2, %p4357_p7 }
  0x34   : > { %p3878_p11 = por %p3877_p10, %p3876_p9 }
  0x35   : > { %p3872_p8 = pneg %p3871_p4 }
  0x36   : > { %3596 = dma.hbm_to_vmem [thread:$0]  (!%p4351_p6), %s4788_s2, 1024, %s467_s19, [#allocation8], %s4759_s20, %s4759_s20, %s4761_s22  }
  0x37   : > { %p3879_p12 = pnand %p3878_p11, %p3872_p8 }
  0x39   : > { %3882 = shalt.err (!%p3879_p12)
}
  0x3a   : > { %s4789_s4 = sld [smem:[#allocation39_spill]]  ;;  %s3894_s16 = scalar_lea.vmem %s515_s23, 1024 }
  0x3b   : > { %p3895_p13 = scmp.ne.s32.totalorder %s515_s23, %s3894_s16  ;;  %p3902_p4 = scmp.lt.s32.totalorder %s515_s23, %s515_s23 }
  0x3c   : > { %p3903_p9 = scmp.lt.s32.totalorder %s3894_s16, %s3894_s16 }
  0x3d   : > { %p3897_p0 = pnand %p3895_p13, %p4357_p7 }
  0x3e   : > { %p3904_p8 = por %p3903_p9, %p3902_p4 }
  0x3f   : > { %p3898_p2 = pneg %p3897_p0 }
  0x40   : > { %3599 = dma.hbm_to_vmem [thread:$0]  (!%p4351_p6), %s4789_s4, 1024, %s483_s21, [#allocation11], %s4759_s20, %s4759_s20, %s4761_s22  }
  0x41   : > { %p3905_p10 = pnand %p3904_p8, %p3898_p2 }
  0x43   : > { %3908 = shalt.err (!%p3905_p10)
}
  0x44   : > { %s4790_s8 = sld [smem:[#allocation42_spill]]  ;;  %s4206_s27 = smov [#allocation16]  }
  0x45   : > { %s546_s19 = sshll.u32 %s4206_s27, 4  ;;  %s4207_s21 = smov [#allocation12]   ;;  %s547_s19 = int_to_ptr.vmem [resolvable:$true] %s546_s19 }
  0x46   : > { %s498_s18 = sshll.u32 %s4207_s21, 4  ;;  %s3920_s2 = scalar_lea.vmem %s547_s19, 1024  ;;  %s499_s18 = int_to_ptr.vmem [resolvable:$true] %s498_s18 }
  0x47   : > { %p3921_p11 = scmp.ne.s32.totalorder %s547_s19, %s3920_s2  ;;  %p3928_p0 = scmp.lt.s32.totalorder %s547_s19, %s547_s19 }
  0x48   : > { %p3929_p2 = scmp.lt.s32.totalorder %s3920_s2, %s3920_s2 }
  0x49   : > { %p3923_p12 = pnand %p3921_p11, %p4357_p7 }
  0x4a   : > { %3605 = dma.hbm_to_vmem [thread:$0]  (!%p4351_p6), %s4790_s8, 1024, %s515_s23, [#allocation14], %s4759_s20, %s4759_s20, %s4761_s22  }
  0x4b   : > { %p3924_p13 = pneg %p3923_p12  ;;  %p3930_p4 = por %p3929_p2, %p3928_p0 }
  0x4d   : > { %p3931_p9 = pnand %p3930_p4, %p3924_p13 }
  0x4f   : > { %3934 = shalt.err (!%p3931_p9)
}
  0x50   : > { %s4791_s12 = sld [smem:[#allocation44_spill]]  ;;  %s3946_s13 = scalar_lea.vmem %s499_s18, 1024 }
  0x51   : > { %p3947_p8 = scmp.ne.s32.totalorder %s499_s18, %s3946_s13  ;;  %p3954_p12 = scmp.lt.s32.totalorder %s499_s18, %s499_s18 }
  0x52   : > { %p3955_p0 = scmp.lt.s32.totalorder %s3946_s13, %s3946_s13 }
  0x53   : > { %p3949_p10 = pnand %p3947_p8, %p4357_p7 }
  0x54   : > { %p3956_p13 = por %p3955_p0, %p3954_p12 }
  0x55   : > { %p3950_p11 = pneg %p3949_p10 }
  0x56   : > { %3611 = dma.hbm_to_vmem [thread:$0]  (!%p4351_p6), %s4791_s12, 1024, %s547_s19, [#allocation17], %s4759_s20, %s4759_s20, %s4761_s22  }
  0x57   : > { %p3957_p2 = pnand %p3956_p13, %p3950_p11 }
  0x59   : > { %3960 = shalt.err (!%p3957_p2)
}
  0x5a   : > { %s4792_s6 = sld [smem:[#allocation41_spill]]  ;;  %s4208_s27 = smov [#allocation15]  }
  0x5b   : > { %s530_s19 = sshll.u32 %s4208_s27, 4  ;;  %s4209_s21 = smov [#allocation18]   ;;  %s531_s19 = int_to_ptr.vmem [resolvable:$true] %s530_s19 }
  0x5c   : > { %s562_s23 = sshll.u32 %s4209_s21, 4  ;;  %s3972_s16 = scalar_lea.vmem %s531_s19, 1024  ;;  %s563_s23 = int_to_ptr.vmem [resolvable:$true] %s562_s23 }
  0x5d   : > { %p3973_p4 = scmp.ne.s32.totalorder %s531_s19, %s3972_s16  ;;  %p3980_p10 = scmp.lt.s32.totalorder %s531_s19, %s531_s19 }
  0x5e   : > { %p3981_p11 = scmp.lt.s32.totalorder %s3972_s16, %s3972_s16 }
  0x5f   : > { %p3975_p9 = pnand %p3973_p4, %p4357_p7 }
  0x60   : > { %3602 = dma.hbm_to_vmem [thread:$0]  (!%p4351_p6), %s4792_s6, 1024, %s499_s18, [#allocation11], %s4759_s20, %s4759_s20, %s4761_s22  }
  0x61   : > { %p3976_p8 = pneg %p3975_p9  ;;  %p3982_p12 = por %p3981_p11, %p3980_p10 }
  0x63   : > { %p3983_p0 = pnand %p3982_p12, %p3976_p8 }
  0x65   : > { %3986 = shalt.err (!%p3983_p0)
}
  0x66   : > { %s4793_s10 = sld [smem:[#allocation43_spill]]  ;;  %s3998_s2 = scalar_lea.vmem %s563_s23, 1024 }
  0x67   : > { %p3999_p13 = scmp.ne.s32.totalorder %s563_s23, %s3998_s2  ;;  %p4006_p9 = scmp.lt.s32.totalorder %s563_s23, %s563_s23 }
  0x68   : > { %p4007_p10 = scmp.lt.s32.totalorder %s3998_s2, %s3998_s2 }
  0x69   : > { %p4001_p2 = pnand %p3999_p13, %p4357_p7 }
  0x6a   : > { %p4008_p8 = por %p4007_p10, %p4006_p9 }
  0x6b   : > { %p4002_p4 = pneg %p4001_p2 }
  0x6c   : > { %3608 = dma.hbm_to_vmem [thread:$0]  (!%p4351_p6), %s4793_s10, 1024, %s531_s19, [#allocation14], %s4759_s20, %s4759_s20, %s4761_s22  }
  0x6d   : > { %p4009_p11 = pnand %p4008_p8, %p4002_p4 }
  0x6f   : > { %4012 = shalt.err (!%p4009_p11)
}
  0x70   : > { %s4794_s14 = sld [smem:[#allocation46_spill]]  ;;  %s4210_s19 = smov [#allocation19]  }
  0x71   : > { %s575_s21 = sshll.u32 %s4210_s19, 4  ;;  %s576_s21 = int_to_ptr.vmem [resolvable:$true] %s575_s21 }
  0x72   : > { %s4024_s16 = scalar_lea.vmem %s576_s21, 1024  ;;  %p4032_p2 = scmp.lt.s32.totalorder %s576_s21, %s576_s21 }
  0x73   : > { %p4025_p12 = scmp.ne.s32.totalorder %s576_s21, %s4024_s16  ;;  %p4033_p4 = scmp.lt.s32.totalorder %s4024_s16, %s4024_s16 }
  0x75   : > { %p4027_p0 = pnand %p4025_p12, %p4357_p7  ;;  %p4034_p9 = por %p4033_p4, %p4032_p2 }
  0x76   : > { %3614 = dma.hbm_to_vmem [thread:$0]  (!%p4351_p6), %s4794_s14, 1024, %s563_s23, [#allocation17], %s4759_s20, %s4759_s20, %s4761_s22  }
  0x77   : > { %p4028_p13 = pneg %p4027_p0 }
  0x79   : > { %p4035_p10 = pnand %p4034_p9, %p4028_p13 }
  0x7b   : > { %4038 = shalt.err (!%p4035_p10)
}
  0x7c   : > { %s4795_s15 = sld [smem:[#allocation47_spill]]  ;;  %s2849_s17 = sadd.s32 4294967294, %s4199_s29  }
  0x7d   : > { %s52_s1 = sadd.s32 1, %s4195_s28  ;;  %s61_s13 = sadd.s32 1, %s4187_s26 }
  0x7e   : > { %p54_p7 = scmp.ge.s32.totalorder %s52_s1, 2  ;;  %p68_p8 = scmp.ne.s32.totalorder %s4187_s26, %s4183_s25 }
  0x7f   : > { %p69_p11 = scmp.eq.s32.totalorder %s4199_s29, 0  ;;  %p74_p0 = scmp.ne.s32.totalorder %s4183_s25, %s4179_s24 }
  0x80   : > { %s4825_s1 = smov (%p54_p7, %s52_s1), 0  ;;  %p447_p9 = scmp.eq.s32.totalorder %s2849_s17, 1 }
  0x81   : > { %4796 = sst [smem:[#allocation33_spill]] %s4825_s1  ;;  %p4449_p12 = por %p69_p11, %p68_p8 }
  0x82   : > { %3617 = dma.hbm_to_vmem [thread:$0]  (!%p4351_p6), %s4795_s15, 1024, %s576_s21, [#allocation20], %s4759_s20, %s4759_s20, %s4761_s22  }
  0x83   : > { %s56_s5 = ssub.s32 %s4195_s28, %s4825_s1  ;;  %p441_p6 = scmp.eq.s32.totalorder %s4337_s0, 1 }
  0x84   : > { %p59_p13 = scmp.eq.s32.totalorder %s56_s5, 0  ;;  %p4460_p2 = por %p75_p1, %p74_p0 }
  0x85   : > { %p4464_p4 = por %p441_p6, %p68_p8  ;;  %p4471_p10 = por %p447_p9, %p74_p0 }
  0x86   : > { %s4469_s21 = scalar_select %p59_p13, %s4187_s26, %s61_s13  }
  0x87   : > { %s4801_s16 = scalar_select %p4471_p10, 1, 0 }
  0x88   : > { %4800 = sst [smem:[#allocation34_spill]] %s4469_s21  ;;  %p3637_p7 = scmp.lt.s32.totalorder %s4199_s29, 2 }
  0x89   : > { %4802 = sst [smem:[#allocation35_spill]] %s4801_s16  ;;  %s4477_s18 = sand.u32 1, %s4187_s26  }
  0x8a   : > { %s3014_s23 = sshll.u32 %s4195_s28, 9  ;;  %s2860_s5 = sshll.u32 %s4477_s18, 5 }
  0x8b   : > { %s4803_s4 = sld [smem:[#allocation36_spill]]  ;;  %s596_s8 = scalar_lea.vmem [#allocation4], %s2860_s5 }
  0x8c   : > { %s605_s10 = sshll.u32 %s596_s8, 4  ;;  %p4486_p8 = pnand %p3637_p7, %p4449_p12  ;;  %s606_s10 = int_to_ptr.vmem [resolvable:$true] %s605_s10 }
  0x8d   : > { %s615_s13 = sand.u32 1, %s4199_s29   ;;  %s593_s12 = scalar_lea.sflag [#allocation5], %s4477_s18 }
  0x8e   : > { %p4041_p11 = pneg %p4486_p8  ;;  %s4052_s14 = scalar_lea.vmem %s606_s10, 512 }
  0x8f   : > { %p4053_p0 = scmp.ne.s32.totalorder %s606_s10, %s4052_s14 }
  0x91   : > { %s604_s6 = scalar_lea.hbm %s4803_s4, %s3014_s23  ;;  %p4055_p6 = pnand %p4053_p0, %p4041_p11 }
  0x92   : > { %s4211_s4 = smov [#allocation4]  }
  0x93   : > { %p4056_p13 = pneg %p4055_p6  ;;  %s4057_s8 = sshll.u32 %s4211_s4, 4  ;;  %s4058_s8 = int_to_ptr.vmem [resolvable:$false] %s4057_s8 }
  0x94   : > { %s4059_s20 = scalar_lea.vmem %s4058_s8, 1024  ;;  %p4060_p12 = scmp.lt.s32.totalorder %s606_s10, %s4058_s8 }
  0x95   : > { %p4061_p9 = scmp.lt.s32.totalorder %s4059_s20, %s4052_s14 }
  0x97   : > { %p4062_p7 = por %p4061_p9, %p4060_p12 }
  0x99   : > { %p4063_p5 = pnand %p4062_p7, %p4056_p13 }
  0x9b   : > { %4066 = shalt.err (!%p4063_p5)
}
  0x9c   : > { %s4805_s22 = smov 4   ;;  %s4806_s2 = smov 64  }
  0x9d   : > { %3621 = dma.hbm_to_vmem [thread:$0]  (!%p4486_p8), %s604_s6, 512, %s606_s10, %s593_s12, %s4806_s2, %s4806_s2, %s4805_s22  }
  0x9e   : > { %s2863_s23 = sshll.u32 %s4477_s18, 6  ;;  %s3015_s5 = sshll.u32 %s4195_s28, 10 }
  0x9f   : > { %s4807_s1 = sld [smem:[#allocation37_spill]]  ;;  %s619_s8 = scalar_lea.vmem [#allocation7], %s2863_s23 }
  0xa0   : > { %s626_s14 = sshll.u32 %s619_s8, 4  ;;  %s616_s20 = scalar_lea.sflag [#allocation8], %s615_s13  ;;  %s627_s14 = int_to_ptr.vmem [resolvable:$true] %s626_s14 }
  0xa1   : > { %s4080_s26 = scalar_lea.vmem %s627_s14, 1024  ;;  %s4212_s29 = smov [#allocation7]  }
  0xa2   : > { %p4081_p5 = scmp.ne.s32.totalorder %s627_s14, %s4080_s26  ;;  %s4085_s16 = sshll.u32 %s4212_s29, 4  ;;  %s4086_s16 = int_to_ptr.vmem [resolvable:$false] %s4085_s16 }
  0xa3   : > { %s4087_s6 = scalar_lea.vmem %s4086_s16, 2048  ;;  %p4088_p13 = scmp.lt.s32.totalorder %s627_s14, %s4086_s16 }
  0xa4   : > { %p4083_p0 = pnand %p4081_p5, %p4041_p11  ;;  %p4089_p12 = scmp.lt.s32.totalorder %s4087_s6, %s4080_s26 }
  0xa5   : > { %s625_s21 = scalar_lea.hbm %s4807_s1, %s3015_s5 }
  0xa6   : > { %p4084_p6 = pneg %p4083_p0  ;;  %p4090_p9 = por %p4089_p12, %p4088_p13 }
  0xa8   : > { %p4091_p7 = pnand %p4090_p9, %p4084_p6 }
  0xaa   : > { %4094 = shalt.err (!%p4091_p7)
}
  0xab   : > { %3624 = dma.hbm_to_vmem [thread:$0]  (!%p4486_p8), %s625_s21, 1024, %s627_s14, %s616_s20, %s4806_s2, %s4806_s2, %s4805_s22  }
  0xac   : > { %638 = sbr.rel (%p4342_p3) target bundleno = 2026 (0x7ea), region = 88  ;;  %s4518_s10 = sand.u32 (!%p4342_p3), 1, %s4183_s25  }
  0xad   : > { %s2867_s12 = sshll.u32 (!%p4342_p3), %s4518_s10, 5  ;;  %s641_s15 = scalar_lea.sflag (!%p4342_p3), [#allocation5], %s4518_s10 }
  0xae   : > { %s4522_s26 = scalar_lea.vmem (!%p4342_p3), [#allocation4], %s2867_s12 }
  0xb1   : > { %4146 = dma.done.wait (%p4460_p2), %s641_s15, 512  }
  0xb2   : > { %4148 = vsyncadd (%p4460_p2), %s641_s15, 4294966784  ;;  %s649_s29 = sand.u32 1, %s4337_s0   ;;  %s2868_s30 = sshll.u32 %s4518_s10, 6 }
  0xb3   : > { %s650_s1 = scalar_lea.sflag [#allocation8], %s649_s29  ;;  %s4532_s21 = scalar_lea.vmem [#allocation7], %s2868_s30 }
  0xb4   : > { %4150 = dma.done.wait (%p4460_p2), %s650_s1, 1024  }
  0xb5   : > { %4152 = vsyncadd (%p4460_p2), %s650_s1, 4294966272 }
  0xb6   : > { %4154 = dma.done.wait (%p75_p1), [#allocation8], 1024  }
  0xb7   : > { %4156 = vsyncadd (%p75_p1), [#allocation8], 4294966272 }
  0xb8   : > { %4158 = dma.done.wait (%p75_p1), [#allocation11], 2048  }
  0xb9   : > { %4160 = vsyncadd (%p75_p1), [#allocation11], 4294965248 }
  0xba   : > { %4162 = dma.done.wait (%p75_p1), [#allocation14], 2048  }
  0xbb   : > { %4164 = vsyncadd (%p75_p1), [#allocation14], 4294965248 }
  0xbc   : > { %4166 = dma.done.wait (%p75_p1), [#allocation17], 2048  }
  0xbd   : > { %4168 = vsyncadd (%p75_p1), [#allocation17], 4294965248 }
  0xbe   : > { %4170 = dma.done.wait (%p75_p1), [#allocation20], 1024  }
  0xbf   : > { %4172 = vsyncadd (%p75_p1), [#allocation20], 4294966272  ;;  %v3707_v0 = vld [vmem:[#allocation12 + $0x38] sm:$0xff]   ;;  %v3708_v1 = vld [vmem:[#allocation12 + $0x30] sm:$0xff]   ;;  %s4808_s4 = sld [smem:[#allocation40_spill]]  ;;  %s2647_s17 = scalar_lea.sflag [#allocation6], %s4518_s10 }
  0xc0   : > { %3275 = vmatprep.subr.bf16.mxu0 %v3707_v0  ;;  %v3709_v2 = vld [vmem:[#allocation12 + $0x28] sm:$0xff]   ;;  %v3710_v3 = vld [vmem:[#allocation12 + $0x20] sm:$0xff]   ;;  %v3711_v5 = vld [vmem:[#allocation12 + $0x18] sm:$0xff]   ;;  %s4809_s20 = sld [smem:[#allocation45_spill]]  ;;  %s4213_s22 = smov [#allocation21]  }
  0xc1   : > { %3276 = vmatpush3.bf16.msra.mxu0 %v3707_v0  ;;  %v3715_v4 = vld [vmem:[%s4532_s21] sm:$0xff]   ;;  %v3712_v6 = vld [vmem:[#allocation12 + $0x10] sm:$0xff]   ;;  %v3723_v7 = vld [vmem:[#allocation13 + $0x38] sm:$0xff]   ;;  %s4810_s15 = sld [smem:[#allocation48_spill]]  ;;  %s4099_s2 = sshll.u32 %s4213_s22, 4  ;;  %s4100_s2 = int_to_ptr.vmem [resolvable:$false] %s4099_s2 }
  0xc2   : > { %3277 = vmatprep.subr.bf16.mxu0 %v3708_v1  ;;  %3291 = vmatprep.mubr.bf16.mxu0 %v3715_v4  ;;  %v3724_v8 = vld [vmem:[#allocation13 + $0x30] sm:$0xff]   ;;  %v3713_v9 = vld [vmem:[#allocation12 + $0x8] sm:$0xff]   ;;  %v3714_v11 = vld [vmem:[#allocation12] sm:$0xff]   ;;  %s4811_s29 = sld [smem:[#allocation31_spill]]  ;;  %s4101_s23 = scalar_lea.vmem %s4100_s2, 2048 }
  0xc3   : > { %3307 = vmatprep.subr.bf16.mxu1 %v3723_v7  ;;  %v3725_v10 = vld [vmem:[#allocation13 + $0x28] sm:$0xff]   ;;  %v3726_v12 = vld [vmem:[#allocation13 + $0x20] sm:$0xff]   ;;  %v3727_v13 = vld [vmem:[#allocation13 + $0x18] sm:$0xff]   ;;  %s4812_s27 = sld [smem:[#allocation49_spill]] }
  0xc4   : > { %3308 = vmatpush3.bf16.msra.mxu1 %v3723_v7  ;;  %v3716_v14 = vld [vmem:[%s4532_s21 + $0x8] sm:$0xff]   ;;  %v3717_v15 = vld [vmem:[%s4532_s21 + $0x10] sm:$0xff]   ;;  %v3718_v16 = vld [vmem:[%s4532_s21 + $0x18] sm:$0xff]  }
  0xc5   : > { %3278 = vmatpush3.bf16.msra.mxu0 %v3708_v1  ;;  %3309 = vmatprep.subr.bf16.mxu1 %v3724_v8  ;;  %v3719_v17 = vld [vmem:[%s4532_s21 + $0x20] sm:$0xff]   ;;  %v3720_v18 = vld [vmem:[%s4532_s21 + $0x28] sm:$0xff]   ;;  %v3721_v19 = vld [vmem:[%s4532_s21 + $0x30] sm:$0xff]  }
  0xc6   : > { %3279 = vmatprep.subr.bf16.mxu0 %v3709_v2  ;;  %v3722_v20 = vld [vmem:[%s4532_s21 + $0x38] sm:$0xff]   ;;  %v3728_v21 = vld [vmem:[#allocation13 + $0x10] sm:$0xff]   ;;  %v3729_v22 = vld [vmem:[#allocation13 + $0x8] sm:$0xff]  }
  0xc7   : > { %v3730_v23 = vld [vmem:[#allocation13] sm:$0xff]   ;;  %v3731_v24 = vld [vmem:[#allocation9 + $0x38] sm:$0xff]   ;;  %v3744_v26 = vld [vmem:[#allocation15 + $0x30] sm:$0xff]  }
  0xc8   : > { %3310 = vmatpush3.bf16.msra.mxu1 %v3724_v8  ;;  %v3743_v25 = vld [vmem:[#allocation15 + $0x38] sm:$0xff]   ;;  %v3745_v27 = vld [vmem:[#allocation15 + $0x28] sm:$0xff]   ;;  %v3746_v28 = vld [vmem:[#allocation15 + $0x20] sm:$0xff]   ;;  %s3048_s1 = sshll.u32 %s4811_s29, 10 }
  0xc9   : > { %3280 = vmatpush3.bf16.msra.mxu0 %v3709_v2  ;;  %3311 = vmatprep.subr.bf16.mxu1 %v3725_v10  ;;  %v3747_v29 = vld [vmem:[#allocation15 + $0x18] sm:$0xff]   ;;  %v3748_v30 = vld [vmem:[#allocation15 + $0x10] sm:$0xff]   ;;  %v3749_v31 = vld [vmem:[#allocation15 + $0x8] sm:$0xff]   ;;  %s4813_s16 = smov %s4812_s27  ;;  %s4690_s18 = scalar_lea.hbm %s4812_s27, %s3048_s1 }
  0xca   : > { %3281 = vmatprep.subr.bf16.mxu0 %v3710_v3  ;;  %v3750_v32 = vld [vmem:[#allocation15] sm:$0xff]   ;;  %v3732_v51 = vld [vmem:[#allocation9 + $0x30] sm:$0xff]   ;;  %v3733_v59 = vld [vmem:[#allocation9 + $0x28] sm:$0xff]  }
  0xcb   : > { %v4569_v35 = vld [vmem:[%s4747_s7] ss:$0 sm:$0xff] }
  0xcc   : > { %3312 = vmatpush3.bf16.msra.mxu1 %v3725_v10 }
  0xcd   : > { %3282 = vmatpush3.bf16.msra.mxu0 %v3710_v3  ;;  %3313 = vmatprep.subr.bf16.mxu1 %v3726_v12  ;;  %v3734_v3 = vld [vmem:[#allocation9 + $0x20] sm:$0xff]  }
  0xce   : > { %3283 = vmatprep.subr.bf16.mxu0 %v3711_v5 }
  0xd0   : > { %3314 = vmatpush3.bf16.msra.mxu1 %v3726_v12 }
  0xd1   : > { %3284 = vmatpush3.bf16.msra.mxu0 %v3711_v5  ;;  %3315 = vmatprep.subr.bf16.mxu1 %v3727_v13 }
  0xd2   : > { %3285 = vmatprep.subr.bf16.mxu0 %v3712_v6 }
  0xd4   : > { %3316 = vmatpush3.bf16.msra.mxu1 %v3727_v13 }
  0xd5   : > { %3286 = vmatpush3.bf16.msra.mxu0 %v3712_v6  ;;  %3317 = vmatprep.subr.bf16.mxu1 %v3728_v21 }
  0xd6   : > { %3287 = vmatprep.subr.bf16.mxu0 %v3713_v9 }
  0xd8   : > { %3318 = vmatpush3.bf16.msra.mxu1 %v3728_v21 }
  0xd9   : > { %3288 = vmatpush3.bf16.msra.mxu0 %v3713_v9  ;;  %3319 = vmatprep.subr.bf16.mxu1 %v3729_v22 }
  0xda   : > { %3289 = vmatprep.subr.bf16.mxu0 %v3714_v11 }
  0xdc   : > { %3320 = vmatpush3.bf16.msra.mxu1 %v3729_v22 }
  0xdd   : > { %3290 = vmatpush3.bf16.msra.mxu0 %v3714_v11  ;;  %3321 = vmatprep.subr.bf16.mxu1 %v3730_v23  ;;  %v3735_v11 = vld [vmem:[#allocation9 + $0x18] sm:$0xff]  }
  0xde   : > { %3339 = vmatprep.subr.bf16.mxu0 %v3743_v25 }
  0xe0   : > { %3292 = vmatmul.mubr.bf16.vlgmr.msra.gmra.mxu0 %v3716_v14  ;;  %3322 = vmatpush3.bf16.msra.mxu1 %v3730_v23 }
  0xe1   : > { %3295 = vmatprep.mubr.bf16.mxu0 %v3717_v15  ;;  %3371 = vmatprep.subr.bf16.mxu1 %v3731_v24 }
  0xe2   : > { %3340 = vmatpush3.bf16.msra.mxu0 %v3743_v25 }
  0xe3   : > { %3341 = vmatprep.subr.bf16.mxu0 %v3744_v26 }
  0xe6   : > { %3342 = vmatpush3.bf16.msra.mxu0 %v3744_v26  ;;  %v3737_v26 = vld [vmem:[#allocation9 + $0x8] sm:$0xff]  }
  0xe7   : > { %3343 = vmatprep.subr.bf16.mxu0 %v3745_v27 }
  0xe8   : > { %3296 = vmatmul.mubr.bf16.gmra.mxu0 %v3718_v16 }
  0xe9   : > { %3299 = vmatprep.mubr.bf16.mxu0 %v3719_v17 }
  0xea   : > { %3344 = vmatpush3.bf16.msra.mxu0 %v3745_v27 }
  0xeb   : > { %3345 = vmatprep.subr.bf16.mxu0 %v3746_v28 }
  0xee   : > { %3346 = vmatpush3.bf16.msra.mxu0 %v3746_v28 }
  0xef   : > { %3347 = vmatprep.subr.bf16.mxu0 %v3747_v29 }
  0xf0   : > { %3300 = vmatmul.mubr.bf16.gmra.mxu0 %v3720_v18 }
  0xf1   : > { %3303 = vmatprep.mubr.bf16.mxu0 %v3721_v19 }
  0xf2   : > { %3348 = vmatpush3.bf16.msra.mxu0 %v3747_v29 }
  0xf3   : > { %3349 = vmatprep.subr.bf16.mxu0 %v3748_v30 }
  0xf6   : > { %3350 = vmatpush3.bf16.msra.mxu0 %v3748_v30 }
  0xf7   : > { %3351 = vmatprep.subr.bf16.mxu0 %v3749_v31 }
  0xf8   : > { %3304 = vmatmul.mubr.bf16.gmra.mxu0 %v3722_v20 }
  0xf9   : > { %3355 = vmatprep.mubr.bf16.mxu0 %v3715_v4 }
  0xfa   : > { %3352 = vmatpush3.bf16.msra.mxu0 %v3749_v31  ;;  %v4588_v31 = vld [vmem:[%s4522_s26] sm:$0xff]  }
  0xfb   : > { %3353 = vmatprep.subr.bf16.mxu0 %v3750_v32 }
  0xfe   : > { %3354 = vmatpush3.bf16.msra.mxu0 %v3750_v32 }
 0x101   : > { %3356 = vmatmul.mubr.bf16.vlgmr.msra.gmra.mxu0 %v3716_v14 }
 0x102   : > { %3359 = vmatprep.mubr.bf16.mxu0 %v3717_v15 }
 0x109   : > { %3360 = vmatmul.mubr.bf16.gmra.mxu0 %v3718_v16 }
 0x10a   : > { %3363 = vmatprep.mubr.bf16.mxu0 %v3719_v17 }
 0x111   : > { %3364 = vmatmul.mubr.bf16.gmra.mxu0 %v3720_v18 }
 0x112   : > { %3367 = vmatprep.mubr.bf16.mxu0 %v3721_v19  ;;  %v3736_v19 = vld [vmem:[#allocation9 + $0x10] sm:$0xff]  }
 0x119   : > { %3368 = vmatmul.mubr.bf16.gmra.mxu0 %v3722_v20 }
 0x1a0   : > { %v3293_v33 = vpop.f32.mrf.mxu0 }
 0x1a1   : > { %v926_v39 = vadd.f32 %v3293_v33, %v4569_v35  ;;  %v3738_v33 = vld [vmem:[#allocation9] sm:$0xff]  }
 0x1a2   : > { %v917_v34 = vpop.f32.mrf.mxu0 }
 0x1a3   : > { %v918_v37 = vadd.f32 %v4569_v35, %v917_v34  ;;  %v982_v46 = vmax.f32 %v926_v39, 0.0  ;;  %v4592_v34 = vld [vmem:[%s4522_s26 + $0x8] sm:$0xff]  }
 0x1a4   : > { %v3294_v36 = vpop.f32.mrf.mxu0  ;;  %v3753_v39 = vld [vmem:[#allocation10 + $0x28] sm:$0xff]  }
 0x1a5   : > { %v929_v38 = vadd.f32 %v3294_v36, %v4569_v35  ;;  %v980_v44 = vmax.f32 %v918_v37, 0.0  ;;  %v4600_v36 = vld [vmem:[%s4522_s26 + $0x18] sm:$0xff]  }
 0x1a6   : > { %v920_v40 = vpop.f32.mrf.mxu0  ;;  %v3751_v37 = vld [vmem:[#allocation10 + $0x38] sm:$0xff]  }
 0x1a7   : > { %v921_v41 = vadd.f32 %v4569_v35, %v920_v40  ;;  %v983_v42 = vmax.f32 %v929_v38, 0.0  ;;  %3395 = vmatprep.subr.bf16.mxu0 %v3751_v37  ;;  %v3752_v38 = vld [vmem:[#allocation10 + $0x30] sm:$0xff]   ;;  %v3754_v40 = vld [vmem:[#allocation10 + $0x20] sm:$0xff]  }
 0x1a8   : > { %v3297_v43 = vpop.f32.mrf.mxu0  ;;  %3396 = vmatpush3.bf16.msra.mxu0 %v3751_v37 }
 0x1a9   : > { %v981_v45 = vmax.f32 %v921_v41, 0.0  ;;  %v997_v49 = vpack.c.bf16 %v983_v42, %v982_v46  ;;  %v942_v54 = vadd.f32 %v3297_v43, %v4569_v35  ;;  %3397 = vmatprep.subr.bf16.mxu0 %v3752_v38  ;;  %v3755_v41 = vld [vmem:[#allocation10 + $0x18] sm:$0xff]   ;;  %v3756_v42 = vld [vmem:[#allocation10 + $0x10] sm:$0xff]   ;;  %v3757_v43 = vld [vmem:[#allocation10 + $0x8] sm:$0xff]  }
 0x1aa   : > { %v933_v47 = vpop.f32.mrf.mxu0  ;;  %v4606_v46 = vld [vmem:[%s4751_s11] ss:$0 sm:$0xff] }
 0x1ab   : > { %v996_v48 = vpack.c.bf16 %v981_v45, %v980_v44  ;;  %v934_v52 = vadd.f32 %v4569_v35, %v933_v47  ;;  %v986_v62 = vmax.f32 %v942_v54, 0.0  ;;  %v3758_v44 = vld [vmem:[#allocation10] sm:$0xff]  }
 0x1ac   : > { %v3298_v50 = vpop.f32.mrf.mxu0  ;;  %3398 = vmatpush3.bf16.msra.mxu0 %v3752_v38 }
 0x1ad   : > { %v945_v53 = vadd.f32 %v3298_v50, %v4569_v35  ;;  %3323 = vmatprep.mubr.bf16.mxu1 %v996_v48  ;;  %v984_v60 = vmax.f32 %v934_v52, 0.0  ;;  %3399 = vmatprep.subr.bf16.mxu0 %v3753_v39 }
 0x1ae   : > { %v936_v55 = vpop.f32.mrf.mxu0  ;;  %3324 = vmatmul.mubr.bf16.vlgmr.msra.gmra.mxu1 %v997_v49 }
 0x1af   : > { %v937_v56 = vadd.f32 %v4569_v35, %v936_v55  ;;  %3372 = vmatpush3.bf16.msra.mxu1 %v3731_v24  ;;  %v987_v57 = vmax.f32 %v945_v53, 0.0 }
 0x1b0   : > { %v3301_v58 = vpop.f32.mrf.mxu0  ;;  %3373 = vmatprep.subr.bf16.mxu1 %v3732_v51  ;;  %3400 = vmatpush3.bf16.msra.mxu0 %v3753_v39 }
 0x1b1   : > { %v985_v61 = vmax.f32 %v937_v56, 0.0  ;;  %v999_v1 = vpack.c.bf16 %v987_v57, %v986_v62  ;;  %v958_v6 = vadd.f32 %v3301_v58, %v4569_v35  ;;  %3401 = vmatprep.subr.bf16.mxu0 %v3754_v40 }
 0x1b2   : > { %v949_v63 = vpop.f32.mrf.mxu0 }
 0x1b3   : > { %v998_v0 = vpack.c.bf16 %v985_v61, %v984_v60  ;;  %3374 = vmatpush3.bf16.msra.mxu1 %v3732_v51  ;;  %v950_v4 = vadd.f32 %v4569_v35, %v949_v63  ;;  %v990_v14 = vmax.f32 %v958_v6, 0.0 }
 0x1b4   : > { %v3302_v2 = vpop.f32.mrf.mxu0  ;;  %3375 = vmatprep.subr.bf16.mxu1 %v3733_v59  ;;  %3402 = vmatpush3.bf16.msra.mxu0 %v3754_v40 }
 0x1b5   : > { %v961_v5 = vadd.f32 %v3302_v2, %v4569_v35  ;;  %3327 = vmatprep.mubr.bf16.mxu1 %v998_v0  ;;  %v988_v12 = vmax.f32 %v950_v4, 0.0  ;;  %3403 = vmatprep.subr.bf16.mxu0 %v3755_v41 }
 0x1b6   : > { %v952_v7 = vpop.f32.mrf.mxu0  ;;  %3328 = vmatmul.mubr.bf16.gmra.mxu1 %v999_v1 }
 0x1b7   : > { %v953_v8 = vadd.f32 %v4569_v35, %v952_v7  ;;  %3376 = vmatpush3.bf16.msra.mxu1 %v3733_v59  ;;  %v991_v9 = vmax.f32 %v961_v5, 0.0 }
 0x1b8   : > { %v3305_v10 = vpop.f32.mrf.mxu0  ;;  %3377 = vmatprep.subr.bf16.mxu1 %v3734_v3  ;;  %3404 = vmatpush3.bf16.msra.mxu0 %v3755_v41 }
 0x1b9   : > { %v989_v13 = vmax.f32 %v953_v8, 0.0  ;;  %v1001_v17 = vpack.c.bf16 %v991_v9, %v990_v14  ;;  %v974_v22 = vadd.f32 %v3305_v10, %v4569_v35  ;;  %3405 = vmatprep.subr.bf16.mxu0 %v3756_v42 }
 0x1ba   : > { %v965_v15 = vpop.f32.mrf.mxu0 }
 0x1bb   : > { %v1000_v16 = vpack.c.bf16 %v989_v13, %v988_v12  ;;  %3378 = vmatpush3.bf16.msra.mxu1 %v3734_v3  ;;  %v966_v20 = vadd.f32 %v4569_v35, %v965_v15  ;;  %v994_v29 = vmax.f32 %v974_v22, 0.0 }
 0x1bc   : > { %v3306_v18 = vpop.f32.mrf.mxu0  ;;  %3379 = vmatprep.subr.bf16.mxu1 %v3735_v11  ;;  %3406 = vmatpush3.bf16.msra.mxu0 %v3756_v42 }
 0x1bd   : > { %v977_v21 = vadd.f32 %v3306_v18, %v4569_v35  ;;  %3331 = vmatprep.mubr.bf16.mxu1 %v1000_v16  ;;  %v992_v27 = vmax.f32 %v966_v20, 0.0  ;;  %3407 = vmatprep.subr.bf16.mxu0 %v3757_v43 }
 0x1be   : > { %v968_v23 = vpop.f32.mrf.mxu0  ;;  %3332 = vmatmul.mubr.bf16.gmra.mxu1 %v1001_v17 }
 0x1bf   : > { %v969_v24 = vadd.f32 %v4569_v35, %v968_v23  ;;  %3380 = vmatpush3.bf16.msra.mxu1 %v3735_v11  ;;  %v995_v25 = vmax.f32 %v977_v21, 0.0  ;;  %v4595_v35 = vld [vmem:[%s4522_s26 + $0x10] sm:$0xff]   ;;  %s4675_s26 = scalar_lea.vmem [#allocation21], %s2868_s30 }
 0x1c0   : > { %3381 = vmatprep.subr.bf16.mxu1 %v3736_v19  ;;  %3408 = vmatpush3.bf16.msra.mxu0 %v3757_v43  ;;  %s2662_s30 = sshll.u32 %s4675_s26, 4  ;;  %s4684_s30 = int_to_ptr.vmem [resolvable:$true] %s2662_s30 }
 0x1c1   : > { %v993_v28 = vmax.f32 %v969_v24, 0.0  ;;  %v1003_v32 = vpack.c.bf16 %v995_v25, %v994_v29  ;;  %3409 = vmatprep.subr.bf16.mxu0 %v3758_v44  ;;  %v3357_v45 = vpop.f32.mrf.mxu0  ;;  %s4095_s13 = scalar_lea.vmem %s4684_s30, 1024  ;;  %p4102_p8 = scmp.lt.s32.totalorder %s4684_s30, %s4100_s2 }
 0x1c2   : > { %v1302_v47 = vadd.f32 %v3357_v45, %v4606_v46  ;;  %p4096_p1 = scmp.ne.s32.totalorder %s4684_s30, %s4095_s13  ;;  %p4103_p11 = scmp.lt.s32.totalorder %s4101_s23, %s4095_s13 }
 0x1c3   : > { %v1002_v30 = vpack.c.bf16 %v993_v28, %v992_v27  ;;  %3382 = vmatpush3.bf16.msra.mxu1 %v3736_v19  ;;  %v1293_v48 = vpop.f32.mrf.mxu0  ;;  %v4624_v27 = vld [vmem:[%s4749_s9] ss:$0 sm:$0xff] }
 0x1c4   : > { %3383 = vmatprep.subr.bf16.mxu1 %v3737_v26  ;;  %3410 = vmatpush3.bf16.msra.mxu0 %v3758_v44  ;;  %v1294_v49 = vadd.f32 %v4606_v46, %v1293_v48  ;;  %v1358_v51 = vmax.f32 %v1302_v47, 0.0  ;;  %p4097_p3 = pnand %p4096_p1, %p4464_p4  ;;  %p4104_p5 = por %p4103_p11, %p4102_p8 }
 0x1c5   : > { %3335 = vmatprep.mubr.bf16.mxu1 %v1002_v30  ;;  %v3358_v50 = vpop.f32.mrf.mxu0 }
 0x1c6   : > { %3336 = vmatmul.mubr.bf16.gmra.mxu1 %v1003_v32  ;;  %v1305_v52 = vadd.f32 %v3358_v50, %v4606_v46  ;;  %v1356_v54 = vmax.f32 %v1294_v49, 0.0  ;;  %p4098_p2 = pneg %p4097_p3 }
 0x1c7   : > { %3384 = vmatpush3.bf16.msra.mxu1 %v3737_v26  ;;  %3387 = vmatprep.mubr.bf16.mxu1 %v4588_v31  ;;  %v1296_v53 = vpop.f32.mrf.mxu0 }
 0x1c8   : > { %3385 = vmatprep.subr.bf16.mxu1 %v3738_v33  ;;  %v1359_v55 = vmax.f32 %v1305_v52, 0.0  ;;  %v1297_v56 = vadd.f32 %v4606_v46, %v1296_v53  ;;  %p4105_p0 = pnand %p4104_p5, %p4098_p2 }
 0x1c9   : > { %v3361_v57 = vpop.f32.mrf.mxu0 }
 0x1ca   : > { %v3097_v58 = vpack.c.bf16 %v1359_v55, %v1358_v51  ;;  %v1357_v59 = vmax.f32 %v1297_v56, 0.0  ;;  %v1318_v60 = vadd.f32 %v3361_v57, %v4606_v46 }
 0x1cb   : > { %3386 = vmatpush3.bf16.msra.mxu1 %v3738_v33  ;;  %v1309_v61 = vpop.f32.mrf.mxu0 }
 0x1cc   : > { %3136 = vst [vmem:[#allocation3 + $0x8] sm:$0xff] %v3097_v58   ;;  %v3092_v62 = vpack.c.bf16 %v1357_v59, %v1356_v54  ;;  %v1310_v63 = vadd.f32 %v4606_v46, %v1309_v61  ;;  %v1362_v1 = vmax.f32 %v1318_v60, 0.0 }
 0x1cd   : > { %v3362_v0 = vpop.f32.mrf.mxu0 }
 0x1ce   : > { %3388 = vmatmul.mubr.bf16.vlgmr.msra.gmra.mxu1 %v4592_v34  ;;  %3093 = vst [vmem:[#allocation3] sm:$0xff] %v3092_v62   ;;  %v1321_v2 = vadd.f32 %v3362_v0, %v4606_v46  ;;  %v1360_v4 = vmax.f32 %v1310_v63, 0.0 }
 0x1cf   : > { %3391 = vmatprep.mubr.bf16.mxu1 %v4595_v35  ;;  %v1312_v3 = vpop.f32.mrf.mxu0 }
 0x1d0   : > { %v1363_v5 = vmax.f32 %v1321_v2, 0.0  ;;  %v1313_v6 = vadd.f32 %v4606_v46, %v1312_v3 }
 0x1d1   : > { %v3365_v7 = vpop.f32.mrf.mxu0 }
 0x1d2   : > { %v3107_v8 = vpack.c.bf16 %v1363_v5, %v1362_v1  ;;  %v1361_v9 = vmax.f32 %v1313_v6, 0.0  ;;  %v1334_v10 = vadd.f32 %v3365_v7, %v4606_v46 }
 0x1d3   : > { %v1325_v11 = vpop.f32.mrf.mxu0 }
 0x1d4   : > { %3138 = vst [vmem:[#allocation3 + $0x18] sm:$0xff] %v3107_v8   ;;  %v3102_v12 = vpack.c.bf16 %v1361_v9, %v1360_v4  ;;  %v1326_v13 = vadd.f32 %v4606_v46, %v1325_v11  ;;  %v1366_v15 = vmax.f32 %v1334_v10, 0.0 }
 0x1d5   : > { %v3366_v14 = vpop.f32.mrf.mxu0 }
 0x1d6   : > { %3392 = vmatmul.mubr.bf16.gmra.mxu1 %v4600_v36  ;;  %3137 = vst [vmem:[#allocation3 + $0x10] sm:$0xff] %v3102_v12   ;;  %v1337_v16 = vadd.f32 %v3366_v14, %v4606_v46  ;;  %v1364_v18 = vmax.f32 %v1326_v13, 0.0 }
 0x1d7   : > { %v1328_v17 = vpop.f32.mrf.mxu0 }
 0x1d8   : > { %v1367_v19 = vmax.f32 %v1337_v16, 0.0  ;;  %v1329_v20 = vadd.f32 %v4606_v46, %v1328_v17 }
 0x1d9   : > { %v3369_v21 = vpop.f32.mrf.mxu0 }
 0x1da   : > { %v3117_v22 = vpack.c.bf16 %v1367_v19, %v1366_v15  ;;  %v1365_v23 = vmax.f32 %v1329_v20, 0.0  ;;  %v1350_v24 = vadd.f32 %v3369_v21, %v4606_v46 }
 0x1db   : > { %v1341_v25 = vpop.f32.mrf.mxu0 }
 0x1dc   : > { %3140 = vst [vmem:[#allocation3 + $0x28] sm:$0xff] %v3117_v22   ;;  %v3112_v28 = vpack.c.bf16 %v1365_v23, %v1364_v18  ;;  %v1342_v29 = vadd.f32 %v4606_v46, %v1341_v25  ;;  %v1370_v33 = vmax.f32 %v1350_v24, 0.0 }
 0x1dd   : > { %v3370_v30 = vpop.f32.mrf.mxu0 }
 0x1de   : > { %3139 = vst [vmem:[#allocation3 + $0x20] sm:$0xff] %v3112_v28   ;;  %v1353_v37 = vadd.f32 %v3370_v30, %v4606_v46  ;;  %v1368_v41 = vmax.f32 %v1342_v29, 0.0 }
 0x1df   : > { %v1344_v39 = vpop.f32.mrf.mxu0 }
 0x1e0   : > { %v1371_v42 = vmax.f32 %v1353_v37, 0.0  ;;  %v1345_v43 = vadd.f32 %v4606_v46, %v1344_v39 }
 0x1e2   : > { %v3127_v48 = vpack.c.bf16 %v1371_v42, %v1370_v33  ;;  %v1369_v49 = vmax.f32 %v1345_v43, 0.0  ;;  %v2945_v43 = vld [vmem:[%s4743_s3] ss:$0 sm:$0xff] }
 0x1e4   : > { %3142 = vst [vmem:[#allocation3 + $0x38] sm:$0xff] %v3127_v48   ;;  %v3122_v54 = vpack.c.bf16 %v1369_v49, %v1368_v41 }
 0x1e6   : > { %3141 = vst [vmem:[#allocation3 + $0x30] sm:$0xff] %v3122_v54  }
 0x1eb   : > { %v4637_v3 = vld [vmem:[#allocation3 + $0x38] sm:$0xff]  }
 0x1ec   : > { %3443 = vmatprep.subr.bf16.mxu0 %v4637_v3 }
 0x26e   : > { %v3325_v26 = vpop.f32.mrf.mxu1 }
 0x26f   : > { %v1118_v38 = vadd.f32 %v3325_v26, %v4624_v27 }
 0x270   : > { %v1109_v32 = vpop.f32.mrf.mxu1 }
 0x271   : > { %v1110_v44 = vadd.f32 %v4624_v27, %v1109_v32  ;;  %v1174_v50 = vmax.f32 %v1118_v38, 0.0 }
 0x272   : > { %v3326_v40 = vpop.f32.mrf.mxu1 }
 0x273   : > { %v1121_v45 = vadd.f32 %v3326_v40, %v4624_v27  ;;  %v1172_v55 = vmax.f32 %v1110_v44, 0.0 }
 0x274   : > { %v1112_v47 = vpop.f32.mrf.mxu1 }
 0x275   : > { %v1175_v51 = vmax.f32 %v1121_v45, 0.0  ;;  %v1113_v52 = vadd.f32 %v4624_v27, %v1112_v47 }
 0x276   : > { %v3329_v53 = vpop.f32.mrf.mxu1 }
 0x277   : > { %v3057_v56 = vpack.c.bf16 %v1175_v51, %v1174_v50  ;;  %v1173_v57 = vmax.f32 %v1113_v52, 0.0  ;;  %v1134_v58 = vadd.f32 %v3329_v53, %v4624_v27 }
 0x278   : > { %v1125_v46 = vpop.f32.mrf.mxu1 }
 0x279   : > { %3129 = vst [vmem:[#allocation2 + $0x8] sm:$0xff] %v3057_v56   ;;  %v3052_v59 = vpack.c.bf16 %v1173_v57, %v1172_v55  ;;  %v1126_v61 = vadd.f32 %v4624_v27, %v1125_v46  ;;  %v1178_v63 = vmax.f32 %v1134_v58, 0.0  ;;  %v3768_v58 = vld [vmem:[#allocation3 + $0x30] sm:$0xff]  }
 0x27a   : > { %v3330_v60 = vpop.f32.mrf.mxu1 }
 0x27b   : > { %3053 = vst [vmem:[#allocation2] sm:$0xff] %v3052_v59   ;;  %v1137_v62 = vadd.f32 %v3330_v60, %v4624_v27  ;;  %v1176_v5 = vmax.f32 %v1126_v61, 0.0 }
 0x27c   : > { %v1128_v0 = vpop.f32.mrf.mxu1 }
 0x27d   : > { %v1179_v1 = vmax.f32 %v1137_v62, 0.0  ;;  %v1129_v2 = vadd.f32 %v4624_v27, %v1128_v0 }
 0x27e   : > { %v3333_v4 = vpop.f32.mrf.mxu1 }
 0x27f   : > { %v3067_v6 = vpack.c.bf16 %v1179_v1, %v1178_v63  ;;  %v1177_v7 = vmax.f32 %v1129_v2, 0.0  ;;  %v1150_v10 = vadd.f32 %v3333_v4, %v4624_v27  ;;  %v3769_v4 = vld [vmem:[#allocation3 + $0x28] sm:$0xff]  }
 0x280   : > { %v1141_v8 = vpop.f32.mrf.mxu1 }
 0x281   : > { %3131 = vst [vmem:[#allocation2 + $0x18] sm:$0xff] %v3067_v6   ;;  %v3062_v9 = vpack.c.bf16 %v1177_v7, %v1176_v5  ;;  %v1142_v12 = vadd.f32 %v4624_v27, %v1141_v8  ;;  %v1182_v15 = vmax.f32 %v1150_v10, 0.0 }
 0x282   : > { %v3334_v11 = vpop.f32.mrf.mxu1 }
 0x283   : > { %3130 = vst [vmem:[#allocation2 + $0x10] sm:$0xff] %v3062_v9   ;;  %v1153_v13 = vadd.f32 %v3334_v11, %v4624_v27  ;;  %v1180_v19 = vmax.f32 %v1142_v12, 0.0  ;;  %v3770_v11 = vld [vmem:[#allocation3 + $0x20] sm:$0xff]   ;;  %v3771_v12 = vld [vmem:[#allocation3 + $0x18] sm:$0xff]  }
 0x284   : > { %v1144_v14 = vpop.f32.mrf.mxu1 }
 0x285   : > { %v1183_v16 = vmax.f32 %v1153_v13, 0.0  ;;  %v1145_v17 = vadd.f32 %v4624_v27, %v1144_v14  ;;  %v3772_v13 = vld [vmem:[#allocation3 + $0x10] sm:$0xff]   ;;  %v3773_v14 = vld [vmem:[#allocation3 + $0x8] sm:$0xff]  }
 0x286   : > { %v3337_v18 = vpop.f32.mrf.mxu1 }
 0x287   : > { %v3077_v20 = vpack.c.bf16 %v1183_v16, %v1182_v15  ;;  %v1181_v21 = vmax.f32 %v1145_v17, 0.0  ;;  %v1166_v24 = vadd.f32 %v3337_v18, %v4624_v27  ;;  %v3774_v16 = vld [vmem:[#allocation3] sm:$0xff]   ;;  %v3765_v18 = vld [vmem:[#allocation2 + $0x8] sm:$0xff]  }
 0x288   : > { %v1157_v22 = vpop.f32.mrf.mxu1  ;;  %v3763_v15 = vld [vmem:[#allocation2 + $0x18] sm:$0xff]  }
 0x289   : > { %3133 = vst [vmem:[#allocation2 + $0x28] sm:$0xff] %v3077_v20   ;;  %v3072_v23 = vpack.c.bf16 %v1181_v21, %v1180_v19  ;;  %v1158_v26 = vadd.f32 %v4624_v27, %v1157_v22  ;;  %v1186_v30 = vmax.f32 %v1166_v24, 0.0  ;;  %v3766_v19 = vld [vmem:[#allocation2] sm:$0xff]  }
 0x28a   : > { %v3338_v25 = vpop.f32.mrf.mxu1  ;;  %v3764_v17 = vld [vmem:[#allocation2 + $0x10] sm:$0xff]   ;;  %v2958_v22 = vld [vmem:[%s4808_s4] ss:$0 sm:$0xff] }
 0x28b   : > { %3132 = vst [vmem:[#allocation2 + $0x20] sm:$0xff] %v3072_v23   ;;  %v1169_v28 = vadd.f32 %v3338_v25, %v4624_v27  ;;  %v1184_v38 = vmax.f32 %v1158_v26, 0.0 }
 0x28c   : > { %v1160_v29 = vpop.f32.mrf.mxu1 }
 0x28d   : > { %v1187_v32 = vmax.f32 %v1169_v28, 0.0  ;;  %v1161_v33 = vadd.f32 %v4624_v27, %v1160_v29 }
 0x28e   : > { %v3389_v37 = vpop.f32.mrf.mxu1 }
 0x28f   : > { %v3087_v39 = vpack.c.bf16 %v1187_v32, %v1186_v30  ;;  %v1185_v40 = vmax.f32 %v1161_v33, 0.0  ;;  %v1678_v48 = vadd.f32 %v3389_v37, %v2945_v43 }
 0x290   : > { %v1669_v41 = vpop.f32.mrf.mxu1  ;;  %v3761_v10 = vld [vmem:[#allocation2 + $0x28] sm:$0xff]  }
 0x291   : > { %3135 = vst [vmem:[#allocation2 + $0x38] sm:$0xff] %v3087_v39   ;;  %v3082_v42 = vpack.c.bf16 %v1185_v40, %v1184_v38  ;;  %v1670_v45 = vadd.f32 %v2945_v43, %v1669_v41  ;;  %v1702_v54 = vmax.f32 %v1678_v48, 0.0 }
 0x292   : > { %v3390_v44 = vpop.f32.mrf.mxu1 }
 0x293   : > { %3134 = vst [vmem:[#allocation2 + $0x30] sm:$0xff] %v3082_v42   ;;  %v1681_v47 = vadd.f32 %v3390_v44, %v2945_v43  ;;  %v1700_v52 = vmax.f32 %v1670_v45, 0.0 }
 0x294   : > { %v1672_v49 = vpop.f32.mrf.mxu1 }
 0x295   : > { %v1673_v50 = vadd.f32 %v2945_v43, %v1672_v49  ;;  %v1703_v51 = vmax.f32 %v1681_v47, 0.0 }
 0x296   : > { %v3393_v27 = vpop.f32.mrf.mxu1 }
 0x297   : > { %v1701_v53 = vmax.f32 %v1673_v50, 0.0  ;;  %v1709_v46 = vpack.c.bf16 %v1703_v51, %v1702_v54  ;;  %v1694_v63 = vadd.f32 %v3393_v27, %v2945_v43  ;;  %v1989_v54 = vlaneseq }
 0x298   : > { %v1685_v55 = vpop.f32.mrf.mxu1  ;;  %v3759_v56 = vld [vmem:[#allocation2 + $0x38] sm:$0xff]  }
 0x299   : > { %v1708_v57 = vpack.c.bf16 %v1701_v53, %v1700_v52  ;;  %3419 = vmatprep.subr.bf16.mxu1 %v3759_v56  ;;  %v1686_v61 = vadd.f32 %v2945_v43, %v1685_v55  ;;  %v1706_v7 = vmax.f32 %v1694_v63, 0.0  ;;  %v1990_v55 = vand.u32 127, %v1989_v54 }
 0x29a   : > { %v3394_v59 = vpop.f32.mrf.mxu1  ;;  %v3760_v60 = vld [vmem:[#allocation2 + $0x30] sm:$0xff]   ;;  %3420 = vmatpush3.bf16.xpose.msra.mxu1 %v3759_v56 }
 0x29b   : > { %v1697_v62 = vadd.f32 %v3394_v59, %v2945_v43  ;;  %3411 = vmatprep.mubr.bf16.mxu0 %v1708_v57  ;;  %3421 = vmatprep.subr.bf16.mxu1 %v3760_v60  ;;  %v1704_v5 = vmax.f32 %v1686_v61, 0.0  ;;  %vm1991_vm0 = vcmp.lt.s32.totalorder %v1990_v55, 8 }
 0x29c   : > { %v1688_v0 = vpop.f32.mrf.mxu1  ;;  %3412 = vmatmul.mubr.bf16.vlgmr.msra.gmra.mxu0 %v1709_v46 }
 0x29d   : > { %v1689_v1 = vadd.f32 %v2945_v43, %v1688_v0  ;;  %3444 = vmatpush3.bf16.msra.mxu0 %v4637_v3  ;;  %v1707_v2 = vmax.f32 %v1697_v62, 0.0  ;;  %v3762_v3 = vld [vmem:[#allocation2 + $0x20] sm:$0xff]  }
 0x29e   : > { %3445 = vmatprep.subr.bf16.mxu0 %v3768_v58 }
 0x29f   : > { %v1705_v6 = vmax.f32 %v1689_v1, 0.0  ;;  %v1711_v9 = vpack.c.bf16 %v1707_v2, %v1706_v7 }
 0x2a1   : > { %v1710_v8 = vpack.c.bf16 %v1705_v6, %v1704_v5  ;;  %3446 = vmatpush3.bf16.msra.mxu0 %v3768_v58 }
 0x2a2   : > { %3447 = vmatprep.subr.bf16.mxu0 %v3769_v4  ;;  %3422 = vmatpush3.bf16.xpose.msra.mxu1 %v3760_v60 }
 0x2a3   : > { %3415 = vmatprep.mubr.bf16.mxu0 %v1710_v8  ;;  %3423 = vmatprep.subr.bf16.mxu1 %v3761_v10 }
 0x2a4   : > { %3416 = vmatmul.mubr.bf16.gmra.mxu0 %v1711_v9 }
 0x2a5   : > { %3448 = vmatpush3.bf16.msra.mxu0 %v3769_v4 }
 0x2a6   : > { %3449 = vmatprep.subr.bf16.mxu0 %v3770_v11 }
 0x2a9   : > { %3450 = vmatpush3.bf16.msra.mxu0 %v3770_v11 }
 0x2aa   : > { %3451 = vmatprep.subr.bf16.mxu0 %v3771_v12  ;;  %3424 = vmatpush3.bf16.xpose.msra.mxu1 %v3761_v10 }
 0x2ab   : > { %3425 = vmatprep.subr.bf16.mxu1 %v3762_v3 }
 0x2ad   : > { %3452 = vmatpush3.bf16.msra.mxu0 %v3771_v12 }
 0x2ae   : > { %3453 = vmatprep.subr.bf16.mxu0 %v3772_v13 }
 0x2b1   : > { %3454 = vmatpush3.bf16.msra.mxu0 %v3772_v13 }
 0x2b2   : > { %3455 = vmatprep.subr.bf16.mxu0 %v3773_v14  ;;  %3426 = vmatpush3.bf16.xpose.msra.mxu1 %v3762_v3 }
 0x2b3   : > { %3427 = vmatprep.subr.bf16.mxu1 %v3763_v15 }
 0x2b5   : > { %3456 = vmatpush3.bf16.msra.mxu0 %v3773_v14 }
 0x2b6   : > { %3457 = vmatprep.subr.bf16.mxu0 %v3774_v16 }
 0x2b9   : > { %3458 = vmatpush3.bf16.msra.mxu0 %v3774_v16 }
 0x2ba   : > { %3428 = vmatpush3.bf16.xpose.msra.mxu1 %v3763_v15 }
 0x2bb   : > { %3429 = vmatprep.subr.bf16.mxu1 %v3764_v17 }
 0x2c2   : > { %3430 = vmatpush3.bf16.xpose.msra.mxu1 %v3764_v17 }
 0x2c3   : > { %3431 = vmatprep.subr.bf16.mxu1 %v3765_v18 }
 0x2ca   : > { %3432 = vmatpush3.bf16.xpose.msra.mxu1 %v3765_v18 }
 0x2cb   : > { %3433 = vmatprep.subr.bf16.mxu1 %v3766_v19 }
 0x2d2   : > { %3434 = vmatpush3.bf16.xpose.msra.mxu1 %v3766_v19 }
 0x35c   : > { %v3413_v20 = vpop.f32.mrf.mxu0 }
 0x35d   : > { %v1826_v26 = vadd.f32 %v3413_v20, %v2958_v22 }
 0x35e   : > { %v1817_v21 = vpop.f32.mrf.mxu0 }
 0x35f   : > { %v1818_v24 = vadd.f32 %v2958_v22, %v1817_v21  ;;  %v1850_v38 = vmax.f32 %v1826_v26, 0.0 }
 0x360   : > { %v3414_v23 = vpop.f32.mrf.mxu0 }
 0x361   : > { %v1829_v25 = vadd.f32 %v3414_v23, %v2958_v22  ;;  %v1848_v33 = vmax.f32 %v1818_v24, 0.0 }
 0x362   : > { %v1820_v28 = vpop.f32.mrf.mxu0 }
 0x363   : > { %v1821_v29 = vadd.f32 %v2958_v22, %v1820_v28  ;;  %v1851_v30 = vmax.f32 %v1829_v25, 0.0 }
 0x364   : > { %v3417_v32 = vpop.f32.mrf.mxu0 }
 0x365   : > { %v1849_v37 = vmax.f32 %v1821_v29, 0.0  ;;  %v1857_v41 = vpack.c.bf16 %v1851_v30, %v1850_v38  ;;  %v1842_v45 = vadd.f32 %v3417_v32, %v2958_v22 }
 0x366   : > { %v1833_v39 = vpop.f32.mrf.mxu0 }
 0x367   : > { %v1856_v40 = vpack.c.bf16 %v1849_v37, %v1848_v33  ;;  %v1834_v43 = vadd.f32 %v2958_v22, %v1833_v39  ;;  %v1854_v27 = vmax.f32 %v1842_v45, 0.0 }
 0x368   : > { %v3418_v42 = vpop.f32.mrf.mxu0 }
 0x369   : > { %v1845_v44 = vadd.f32 %v3418_v42, %v2958_v22  ;;  %3435 = vmatprep.mubr.bf16.mxu1 %v1856_v40  ;;  %v1852_v50 = vmax.f32 %v1834_v43, 0.0  ;;  %v3775_v43 = vld [vmem:[#allocation16 + $0x38] sm:$0xff]  }
 0x36a   : > { %v1836_v47 = vpop.f32.mrf.mxu0  ;;  %3436 = vmatmul.mubr.bf16.vlgmr.msra.gmra.mxu1 %v1857_v41  ;;  %3467 = vmatprep.subr.bf16.mxu0 %v3775_v43 }
 0x36b   : > { %v1837_v48 = vadd.f32 %v2958_v22, %v1836_v47  ;;  %v1855_v49 = vmax.f32 %v1845_v44, 0.0 }
 0x36d   : > { %v1853_v51 = vmax.f32 %v1837_v48, 0.0  ;;  %v1859_v53 = vpack.c.bf16 %v1855_v49, %v1854_v27 }
 0x36f   : > { %v1858_v52 = vpack.c.bf16 %v1853_v51, %v1852_v50 }
 0x371   : > { %3439 = vmatprep.mubr.bf16.mxu1 %v1858_v52 }
 0x372   : > { %3440 = vmatmul.mubr.bf16.gmra.mxu1 %v1859_v53 }
 0x373   : > { %3507 = vmatprep.mubr.bf16.mxu1 %v4588_v31 }
 0x42a   : > { %v3437_v56 = vpop.f32.mrf.mxu1 }
 0x42b   : > { %v1994_v57 = vsel %vm1991_vm0, %v3437_v56, -1e+30 }
 0x42c   : > { %2004 = vmax.xlane.f32.xlu1 %v1994_v57  ;;  %v1958_v58 = vpop.f32.mrf.mxu1 }
 0x42d   : > { %v1992_v46 = vsel %vm1991_vm0, %v1958_v58, -1e+30 }
 0x42e   : > { %2000 = vmax.xlane.f32.xlu0 %v1992_v46  ;;  %v3438_v59 = vpop.f32.mrf.mxu1 }
 0x42f   : > { %v1995_v60 = vsel %vm1991_vm0, %v3438_v59, -1e+30 }
 0x430   : > { %2006 = vmax.xlane.f32.xlu1 %v1995_v60  ;;  %v1961_v61 = vpop.f32.mrf.mxu1 }
 0x431   : > { %v1993_v62 = vsel %vm1991_vm0, %v1961_v61, -1e+30 }
 0x432   : > { %2002 = vmax.xlane.f32.xlu0 %v1993_v62  ;;  %v3441_v31 = vpop.f32.mrf.mxu1 }
 0x433   : > { %v1998_v4 = vsel %vm1991_vm0, %v3441_v31, -1e+30 }
 0x434   : > { %v1974_v63 = vpop.f32.mrf.mxu1 }
 0x435   : > { %v1996_v0 = vsel %vm1991_vm0, %v1974_v63, -1e+30 }
 0x436   : > { %2008 = vmax.xlane.f32.xlu0 %v1996_v0  ;;  %v3442_v1 = vpop.f32.mrf.mxu1 }
 0x437   : > { %v1999_v6 = vsel %vm1991_vm0, %v3442_v1, -1e+30 }
 0x438   : > { %v1977_v2 = vpop.f32.mrf.mxu1 }
 0x439   : > { %v1997_v5 = vsel %vm1991_vm0, %v1977_v2, -1e+30 }
 0x43a   : > { %2012 = vmax.xlane.f32.xlu0 %v1998_v4  ;;  %2010 = vmax.xlane.f32.xlu1 %v1997_v5 }
 0x43e   : > { %2014 = vmax.xlane.f32.xlu1 %v1999_v6 }
 0x4b5   : > { %v2005_v7 = vpop.xlane.xlu1 %2004 }
 0x4b6   : > { %v2018_v8 = vsub.f32 %v1994_v57, %v2005_v7 }
 0x4b7   : > { %v2001_v9 = vpop.xlane.xlu0 %2000 }
 0x4b8   : > { %v2016_v10 = vsub.f32 %v1992_v46, %v2001_v9  ;;  %v2028_v3 = vmul.f32 1.442695, %v2018_v8  ;;  %v3778_v9 = vld [vmem:[#allocation16 + $0x20] sm:$0xff]  }
 0x4b9   : > { %v2007_v11 = vpop.xlane.xlu1 %2006 }
 0x4ba   : > { %v2024_v12 = vmul.f32 1.442695, %v2016_v10  ;;  %v2019_v13 = vsub.f32 %v1995_v60, %v2007_v11  ;;  %v3779_v10 = vld [vmem:[#allocation16 + $0x18] sm:$0xff]   ;;  %v3780_v11 = vld [vmem:[#allocation16 + $0x10] sm:$0xff]  }
 0x4bb   : > { %v2003_v14 = vpop.xlane.xlu0 %2002 }
 0x4bc   : > { %3799 = vpow2.f32 %v2024_v12  ;;  %v2017_v15 = vsub.f32 %v1993_v62, %v2003_v14  ;;  %v2030_v17 = vmul.f32 1.442695, %v2019_v13  ;;  %v3776_v62 = vld [vmem:[#allocation16 + $0x30] sm:$0xff]   ;;  %v3781_v12 = vld [vmem:[#allocation16 + $0x8] sm:$0xff]   ;;  %v3783_v13 = vld [vmem:[#allocation19 + $0x38] sm:$0xff]  }
 0x4bd   : > { %3801 = vpow2.f32 %v2028_v3  ;;  %v3782_v3 = vld [vmem:[#allocation16] sm:$0xff]   ;;  %v3784_v14 = vld [vmem:[#allocation19 + $0x30] sm:$0xff]   ;;  %3491 = vmatprep.subr.bf16.mxu1 %v3783_v13 }
 0x4be   : > { %v2026_v16 = vmul.f32 1.442695, %v2017_v15  ;;  %v3791_v15 = vld [vmem:[#allocation18 + $0x38] sm:$0xff]   ;;  %3492 = vmatpush3.bf16.msra.mxu1 %v3783_v13  ;;  %v3008_v13 = vld [vmem:[%s4810_s15] ss:$0 sm:$0xff] }
 0x4bf   : > { %v2009_v18 = vpop.xlane.xlu0 %2008  ;;  %3493 = vmatprep.subr.bf16.mxu1 %v3784_v14 }
 0x4c0   : > { %3803 = vpow2.f32 %v2026_v16  ;;  %v2020_v19 = vsub.f32 %v1996_v0, %v2009_v18  ;;  %v3785_v16 = vld [vmem:[#allocation19 + $0x28] sm:$0xff]   ;;  %v3787_v18 = vld [vmem:[#allocation19 + $0x18] sm:$0xff]  }
 0x4c1   : > { %3805 = vpow2.f32 %v2030_v17  ;;  %v3786_v17 = vld [vmem:[#allocation19 + $0x20] sm:$0xff]  }
 0x4c2   : > { %v2032_v20 = vmul.f32 1.442695, %v2020_v19  ;;  %3494 = vmatpush3.bf16.msra.mxu1 %v3784_v14  ;;  %v3788_v19 = vld [vmem:[#allocation19 + $0x10] sm:$0xff]  }
 0x4c3   : > { %v2013_v21 = vpop.xlane.xlu0 %2012  ;;  %v2011_v22 = vpop.xlane.xlu1 %2010  ;;  %3495 = vmatprep.subr.bf16.mxu1 %v3785_v16 }
 0x4c4   : > { %3807 = vpow2.f32 %v2032_v20  ;;  %v2022_v23 = vsub.f32 %v1998_v4, %v2013_v21  ;;  %v2021_v24 = vsub.f32 %v1997_v5, %v2011_v22  ;;  %v3777_v4 = vld [vmem:[#allocation16 + $0x28] sm:$0xff]   ;;  %v3790_v21 = vld [vmem:[#allocation19] sm:$0xff]   ;;  %v3792_v22 = vld [vmem:[#allocation18 + $0x30] sm:$0xff]  }
 0x4c5   : > { %v3789_v20 = vld [vmem:[#allocation19 + $0x8] sm:$0xff]  }
 0x4c6   : > { %v2036_v25 = vmul.f32 1.442695, %v2022_v23  ;;  %v2034_v26 = vmul.f32 1.442695, %v2021_v24  ;;  %3496 = vmatpush3.bf16.msra.mxu1 %v3785_v16  ;;  %v3793_v23 = vld [vmem:[#allocation18 + $0x28] sm:$0xff]   ;;  %v3794_v24 = vld [vmem:[#allocation18 + $0x20] sm:$0xff]  }
 0x4c7   : > { %v2015_v28 = vpop.xlane.xlu1 %2014  ;;  %3497 = vmatprep.subr.bf16.mxu1 %v3786_v17 }
 0x4c8   : > { %3809 = vpow2.f32 %v2036_v25  ;;  %v2023_v29 = vsub.f32 %v1999_v6, %v2015_v28  ;;  %v3795_v25 = vld [vmem:[#allocation18 + $0x18] sm:$0xff]  }
 0x4c9   : > { %v3800_v30 = vpop.eup %3799  ;;  %3811 = vpow2.f32 %v2034_v26 }
 0x4ca   : > { %v2038_v32 = vmul.f32 1.442695, %v2023_v29  ;;  %2040 = vadd.xlane.f32.xlu0 %v3800_v30  ;;  %v3802_v33 = vpop.eup %3801  ;;  %3498 = vmatpush3.bf16.msra.mxu1 %v3786_v17 }
 0x4cb   : > { %3499 = vmatprep.subr.bf16.mxu1 %v3787_v18 }
 0x4cc   : > { %3813 = vpow2.f32 %v2038_v32 }
 0x4cd   : > { %v3804_v37 = vpop.eup %3803 }
 0x4ce   : > { %2044 = vadd.xlane.f32.xlu0 %v3802_v33  ;;  %2042 = vadd.xlane.f32.xlu1 %v3804_v37  ;;  %v3806_v38 = vpop.eup %3805 }
 0x4cf   : > { %3500 = vmatpush3.bf16.msra.mxu1 %v3787_v18 }
 0x4d0   : > { %3501 = vmatprep.subr.bf16.mxu1 %v3788_v19 }
 0x4d1   : > { %v3808_v39 = vpop.eup %3807 }
 0x4d2   : > { %2048 = vadd.xlane.f32.xlu0 %v3808_v39  ;;  %2046 = vadd.xlane.f32.xlu1 %v3806_v38 }
 0x4d3   : > { %3502 = vmatpush3.bf16.msra.mxu1 %v3788_v19 }
 0x4d4   : > { %3503 = vmatprep.subr.bf16.mxu1 %v3789_v20 }
 0x4d5   : > { %v3810_v40 = vpop.eup %3809 }
 0x4d6   : > { %v3812_v41 = vpop.eup %3811  ;;  %2052 = vadd.xlane.f32.xlu0 %v3810_v40 }
 0x4d7   : > { %2050 = vadd.xlane.f32.xlu1 %v3812_v41  ;;  %3504 = vmatpush3.bf16.msra.mxu1 %v3789_v20 }
 0x4d8   : > { %3505 = vmatprep.subr.bf16.mxu1 %v3790_v21 }
 0x4d9   : > { %v3814_v42 = vpop.eup %3813 }
 0x4db   : > { %2054 = vadd.xlane.f32.xlu1 %v3814_v42  ;;  %3506 = vmatpush3.bf16.msra.mxu1 %v3790_v21 }
 0x4dc   : > { %3539 = vmatprep.subr.bf16.mxu1 %v3791_v15 }
 0x4de   : > { %3508 = vmatmul.mubr.bf16.vlgmr.msra.gmra.mxu1 %v4592_v34 }
 0x4df   : > { %3547 = vmatpush3.bf16.msra.mxu1 %v3791_v15  ;;  %3511 = vmatprep.mubr.bf16.mxu1 %v4595_v35 }
 0x4e0   : > { %3540 = vmatprep.subr.bf16.mxu1 %v3792_v22 }
 0x4e3   : > { %3548 = vmatpush3.bf16.msra.mxu1 %v3792_v22 }
 0x4e4   : > { %3541 = vmatprep.subr.bf16.mxu1 %v3793_v23 }
 0x4e6   : > { %3512 = vmatmul.mubr.bf16.gmra.mxu1 %v4600_v36 }
 0x4e7   : > { %3549 = vmatpush3.bf16.msra.mxu1 %v3793_v23 }
 0x4e8   : > { %3542 = vmatprep.subr.bf16.mxu1 %v3794_v24 }
 0x4eb   : > { %3550 = vmatpush3.bf16.msra.mxu1 %v3794_v24 }
 0x4ec   : > { %3543 = vmatprep.subr.bf16.mxu1 %v3795_v25 }
 0x4ef   : > { %3551 = vmatpush3.bf16.msra.mxu1 %v3795_v25 }
 0x553   : > { %v2041_v44 = vpop.xlane.xlu0 %2040 }
 0x554   : > { %3815 = vrcp.f32 %v2041_v44 }
 0x557   : > { %v2045_v45 = vpop.xlane.xlu0 %2044  ;;  %v2043_v47 = vpop.xlane.xlu1 %2042 }
 0x558   : > { %3817 = vrcp.f32 %v2043_v47 }
 0x559   : > { %3819 = vrcp.f32 %v2045_v45  ;;  %v2983_v45 = vld [vmem:[%s4809_s20] ss:$0 sm:$0xff] }
 0x55b   : > { %v2049_v48 = vpop.xlane.xlu0 %2048  ;;  %v2047_v49 = vpop.xlane.xlu1 %2046 }
 0x55c   : > { %3821 = vrcp.f32 %v2047_v49 }
 0x55d   : > { %3823 = vrcp.f32 %v2049_v48 }
 0x55f   : > { %v2053_v50 = vpop.xlane.xlu0 %2052 }
 0x560   : > { %v2051_v51 = vpop.xlane.xlu1 %2050 }
 0x561   : > { %3825 = vrcp.f32 %v2051_v51  ;;  %v3816_v27 = vpop.eup %3815 }
 0x562   : > { %3827 = vrcp.f32 %v2053_v50  ;;  %v2064_v54 = vmul.f32 %v3816_v27, %v3800_v30 }
 0x564   : > { %v2055_v52 = vpop.xlane.xlu1 %2054 }
 0x565   : > { %3829 = vrcp.f32 %v2055_v52  ;;  %v3818_v53 = vpop.eup %3817 }
 0x566   : > { %v2065_v55 = vmul.f32 %v3818_v53, %v3804_v37  ;;  %v3820_v56 = vpop.eup %3819 }
 0x567   : > { %v2066_v46 = vmul.f32 %v3820_v56, %v3802_v33 }
 0x568   : > { %v2072_v57 = vpack.c.bf16 %v2065_v55, %v2064_v54 }
 0x569   : > { %v3822_v58 = vpop.eup %3821 }
 0x56a   : > { %3459 = vmatprep.mubr.bf16.mxu0 %v2072_v57  ;;  %v2067_v59 = vmul.f32 %v3822_v58, %v3806_v38  ;;  %v3824_v60 = vpop.eup %3823 }
 0x56b   : > { %v2068_v63 = vmul.f32 %v3824_v60, %v3808_v39 }
 0x56c   : > { %v2073_v61 = vpack.c.bf16 %v2067_v59, %v2066_v46 }
 0x56e   : > { %v3826_v31 = vpop.eup %3825  ;;  %3460 = vmatmul.mubr.bf16.vlgmr.msra.gmra.mxu0 %v2073_v61 }
 0x56f   : > { %v2069_v0 = vmul.f32 %v3826_v31, %v3812_v41  ;;  %v3828_v1 = vpop.eup %3827  ;;  %3468 = vmatpush3.bf16.msra.mxu0 %v3775_v43  ;;  %v3797_v41 = vld [vmem:[#allocation18 + $0x8] sm:$0xff]  }
 0x570   : > { %3469 = vmatprep.subr.bf16.mxu0 %v3776_v62  ;;  %v2070_v6 = vmul.f32 %v3828_v1, %v3810_v40  ;;  %v3796_v40 = vld [vmem:[#allocation18 + $0x10] sm:$0xff]  }
 0x571   : > { %v2074_v2 = vpack.c.bf16 %v2069_v0, %v2068_v63  ;;  %3544 = vmatprep.subr.bf16.mxu1 %v3796_v40 }
 0x572   : > { %v3830_v5 = vpop.eup %3829  ;;  %3552 = vmatpush3.bf16.msra.mxu1 %v3796_v40 }
 0x573   : > { %3463 = vmatprep.mubr.bf16.mxu0 %v2074_v2  ;;  %v2071_v7 = vmul.f32 %v3830_v5, %v3814_v42  ;;  %3470 = vmatpush3.bf16.msra.mxu0 %v3776_v62  ;;  %v3798_v42 = vld [vmem:[#allocation18] sm:$0xff]  }
 0x574   : > { %3471 = vmatprep.subr.bf16.mxu0 %v3777_v4  ;;  %3545 = vmatprep.subr.bf16.mxu1 %v3797_v41 }
 0x575   : > { %v2075_v8 = vpack.c.bf16 %v2071_v7, %v2070_v6 }
 0x576   : > { %3553 = vmatpush3.bf16.msra.mxu1 %v3797_v41 }
 0x577   : > { %3464 = vmatmul.mubr.bf16.gmra.mxu0 %v2075_v8  ;;  %3546 = vmatprep.subr.bf16.mxu1 %v3798_v42 }
 0x578   : > { %3472 = vmatpush3.bf16.msra.mxu0 %v3777_v4 }
 0x579   : > { %3473 = vmatprep.subr.bf16.mxu0 %v3778_v9 }
 0x57a   : > { %3554 = vmatpush3.bf16.msra.mxu1 %v3798_v42 }
 0x57c   : > { %3474 = vmatpush3.bf16.msra.mxu0 %v3778_v9 }
 0x57d   : > { %3475 = vmatprep.subr.bf16.mxu0 %v3779_v10 }
 0x580   : > { %3476 = vmatpush3.bf16.msra.mxu0 %v3779_v10 }
 0x581   : > { %3477 = vmatprep.subr.bf16.mxu0 %v3780_v11 }
 0x584   : > { %3478 = vmatpush3.bf16.msra.mxu0 %v3780_v11 }
 0x585   : > { %3479 = vmatprep.subr.bf16.mxu0 %v3781_v12 }
 0x588   : > { %3480 = vmatpush3.bf16.msra.mxu0 %v3781_v12 }
 0x589   : > { %3481 = vmatprep.subr.bf16.mxu0 %v3782_v3 }
 0x58c   : > { %3482 = vmatpush3.bf16.msra.mxu0 %v3782_v3 }
 0x58d   : > { %3515 = vmatprep.subr.bf16.mxu0 %v3791_v15 }
 0x59e   : > { %v3509_v7 = vpop.f32.mrf.mxu1 }
 0x5a0   : > { %v2471_v8 = vpop.f32.mrf.mxu1 }
 0x5a2   : > { %v3510_v9 = vpop.f32.mrf.mxu1 }
 0x5a4   : > { %v2474_v10 = vpop.f32.mrf.mxu1 }
 0x5a6   : > { %v3513_v11 = vpop.f32.mrf.mxu1 }
 0x5a8   : > { %v2487_v12 = vpop.f32.mrf.mxu1 }
 0x62e   : > { %v3461_v26 = vpop.f32.mrf.mxu0 }
 0x630   : > { %v2174_v28 = vpop.f32.mrf.mxu0 }
 0x632   : > { %v3462_v34 = vpop.f32.mrf.mxu0 }
 0x633   : > { %v2206_v32 = vpack.c.bf16 %v3462_v34, %v3461_v26 }
 0x634   : > { %v2177_v29 = vpop.f32.mrf.mxu0 }
 0x635   : > { %v2205_v30 = vpack.c.bf16 %v2177_v29, %v2174_v28 }
 0x637   : > { %v3465_v35 = vpop.f32.mrf.mxu0  ;;  %3483 = vmatprep.mubr.bf16.mxu0 %v2205_v30 }
 0x638   : > { %3484 = vmatmul.mubr.bf16.vlgmr.msra.gmra.mxu0 %v2206_v32 }
 0x639   : > { %v2190_v33 = vpop.f32.mrf.mxu0  ;;  %3516 = vmatpush3.bf16.msra.mxu0 %v3791_v15  ;;  %v3514_v15 = vpop.f32.mrf.mxu1 }
 0x63a   : > { %3517 = vmatprep.subr.bf16.mxu0 %v3792_v22 }
 0x63b   : > { %v3466_v37 = vpop.f32.mrf.mxu0 }
 0x63c   : > { %v2208_v39 = vpack.c.bf16 %v3466_v37, %v3465_v35 }
 0x63d   : > { %v2193_v36 = vpop.f32.mrf.mxu0  ;;  %3518 = vmatpush3.bf16.msra.mxu0 %v3792_v22 }
 0x63e   : > { %v2207_v38 = vpack.c.bf16 %v2193_v36, %v2190_v33  ;;  %3519 = vmatprep.subr.bf16.mxu0 %v3793_v23 }
 0x640   : > { %3487 = vmatprep.mubr.bf16.mxu0 %v2207_v38 }
 0x641   : > { %3488 = vmatmul.mubr.bf16.gmra.mxu0 %v2208_v39 }
 0x642   : > { %3520 = vmatpush3.bf16.msra.mxu0 %v3793_v23  ;;  %v2490_v23 = vpop.f32.mrf.mxu1 }
 0x643   : > { %3521 = vmatprep.subr.bf16.mxu0 %v3794_v24 }
 0x646   : > { %3522 = vmatpush3.bf16.msra.mxu0 %v3794_v24 }
 0x647   : > { %3523 = vmatprep.subr.bf16.mxu0 %v3795_v25 }
 0x64a   : > { %3524 = vmatpush3.bf16.msra.mxu0 %v3795_v25 }
 0x64b   : > { %3525 = vmatprep.subr.bf16.mxu0 %v3796_v40 }
 0x64e   : > { %3526 = vmatpush3.bf16.msra.mxu0 %v3796_v40 }
 0x64f   : > { %3527 = vmatprep.subr.bf16.mxu0 %v3797_v41 }
 0x652   : > { %3528 = vmatpush3.bf16.msra.mxu0 %v3797_v41 }
 0x653   : > { %3529 = vmatprep.subr.bf16.mxu0 %v3798_v42 }
 0x656   : > { %3530 = vmatpush3.bf16.msra.mxu0 %v3798_v42 }
 0x6f8   : > { %v3485_v43 = vpop.f32.mrf.mxu0 }
 0x6f9   : > { %v2323_v50 = vadd.f32 %v3485_v43, %v2983_v45 }
 0x6fa   : > { %v2314_v44 = vpop.f32.mrf.mxu0 }
 0x6fb   : > { %v2315_v48 = vadd.f32 %v2983_v45, %v2314_v44  ;;  %v2347_v56 = vmax.f32 %v2323_v50, 0.0 }
 0x6fc   : > { %v3486_v47 = vpop.f32.mrf.mxu0 }
 0x6fd   : > { %v2326_v49 = vadd.f32 %v3486_v47, %v2983_v45  ;;  %v2345_v54 = vmax.f32 %v2315_v48, 0.0 }
 0x6fe   : > { %v2317_v51 = vpop.f32.mrf.mxu0 }
 0x6ff   : > { %v2318_v27 = vadd.f32 %v2983_v45, %v2317_v51  ;;  %v2348_v52 = vmax.f32 %v2326_v49, 0.0 }
 0x701   : > { %v3489_v53 = vpop.f32.mrf.mxu0  ;;  %v2346_v55 = vmax.f32 %v2318_v27, 0.0  ;;  %v2354_v46 = vpack.c.bf16 %v2348_v52, %v2347_v56 }
 0x702   : > { %v2339_v62 = vadd.f32 %v3489_v53, %v2983_v45 }
 0x703   : > { %v2330_v57 = vpop.f32.mrf.mxu0  ;;  %v2353_v58 = vpack.c.bf16 %v2346_v55, %v2345_v54 }
 0x704   : > { %v2331_v60 = vadd.f32 %v2983_v45, %v2330_v57  ;;  %v2351_v4 = vmax.f32 %v2339_v62, 0.0 }
 0x705   : > { %v3490_v59 = vpop.f32.mrf.mxu0  ;;  %3531 = vmatprep.mubr.bf16.mxu0 %v2353_v58 }
 0x706   : > { %v2342_v61 = vadd.f32 %v3490_v59, %v2983_v45  ;;  %3532 = vmatmul.mubr.bf16.vlgmr.msra.gmra.mxu0 %v2354_v46  ;;  %v2349_v1 = vmax.f32 %v2331_v60, 0.0 }
 0x707   : > { %v2333_v31 = vpop.f32.mrf.mxu0 }
 0x708   : > { %v2334_v63 = vadd.f32 %v2983_v45, %v2333_v31  ;;  %v2352_v0 = vmax.f32 %v2342_v61, 0.0 }
 0x70a   : > { %v2350_v2 = vmax.f32 %v2334_v63, 0.0  ;;  %v2356_v6 = vpack.c.bf16 %v2352_v0, %v2351_v4 }
 0x70c   : > { %v2355_v5 = vpack.c.bf16 %v2350_v2, %v2349_v1 }
 0x70e   : > { %3535 = vmatprep.mubr.bf16.mxu1 %v2355_v5 }
 0x70f   : > { %3536 = vmatmul.mubr.bf16.vlgmr.msra.gmra.mxu1 %v2356_v6 }
 0x7c6   : > { %v3533_v3 = vpop.f32.mrf.mxu0 }
 0x7c7   : > { %v2593_v14 = vadd.f32 %v3533_v3, %v3509_v7 }
 0x7c8   : > { %v2584_v16 = vpop.f32.mrf.mxu0 }
 0x7c9   : > { %v2624_v17 = vadd.f32 %v3008_v13, %v2593_v14  ;;  %v2585_v18 = vadd.f32 %v2584_v16, %v2471_v8 }
 0x7ca   : > { %v3534_v19 = vpop.f32.mrf.mxu0 }
 0x7cb   : > { %v2632_v20 = vmax.f32 %v2624_v17, 0.0  ;;  %v2622_v21 = vadd.f32 %v3008_v13, %v2585_v18  ;;  %v2596_v22 = vadd.f32 %v3534_v19, %v3510_v9 }
 0x7cc   : > { %v2587_v24 = vpop.f32.mrf.mxu0 }
 0x7cd   : > { %2640 = vst [vmem:[%s4675_s26 + $0x10] sm:$0xff] %v2632_v20  ;;  %v2630_v25 = vmax.f32 %v2622_v21, 0.0  ;;  %v2625_v26 = vadd.f32 %v3008_v13, %v2596_v22  ;;  %v2588_v28 = vadd.f32 %v2587_v24, %v2474_v10 }
 0x7cf   : > { %v3537_v34 = vpop.f32.mrf.mxu1  ;;  %2638 = vst [vmem:[%s4675_s26] sm:$0xff] %v2630_v25  ;;  %v2633_v29 = vmax.f32 %v2625_v26, 0.0  ;;  %v2623_v30 = vadd.f32 %v3008_v13, %v2588_v28 }
 0x7d0   : > { %v2609_v32 = vadd.f32 %v3537_v34, %v3513_v11 }
 0x7d1   : > { %v2600_v35 = vpop.f32.mrf.mxu1  ;;  %2641 = vst [vmem:[%s4675_s26 + $0x18] sm:$0xff] %v2633_v29  ;;  %v2631_v33 = vmax.f32 %v2623_v30, 0.0 }
 0x7d2   : > { %v2628_v37 = vadd.f32 %v3008_v13, %v2609_v32  ;;  %v2601_v36 = vadd.f32 %v2600_v35, %v2487_v12 }
 0x7d3   : > { %v3538_v38 = vpop.f32.mrf.mxu1  ;;  %2639 = vst [vmem:[%s4675_s26 + $0x8] sm:$0xff] %v2631_v33 }
 0x7d4   : > { %v2636_v39 = vmax.f32 %v2628_v37, 0.0  ;;  %v2626_v40 = vadd.f32 %v3008_v13, %v2601_v36  ;;  %v2612_v41 = vadd.f32 %v3538_v38, %v3514_v15 }
 0x7d5   : > { %v2603_v42 = vpop.f32.mrf.mxu1 }
 0x7d6   : > { %2644 = vst [vmem:[%s4675_s26 + $0x30] sm:$0xff] %v2636_v39  ;;  %v2634_v43 = vmax.f32 %v2626_v40, 0.0  ;;  %v2629_v44 = vadd.f32 %v3008_v13, %v2612_v41  ;;  %v2604_v45 = vadd.f32 %v2603_v42, %v2490_v23 }
 0x7d8   : > { %2642 = vst [vmem:[%s4675_s26 + $0x20] sm:$0xff] %v2634_v43  ;;  %v2637_v47 = vmax.f32 %v2629_v44, 0.0  ;;  %v2627_v48 = vadd.f32 %v3008_v13, %v2604_v45 }
 0x7da   : > { %2645 = vst [vmem:[%s4675_s26 + $0x38] sm:$0xff] %v2637_v47  ;;  %v2635_v49 = vmax.f32 %v2627_v48, 0.0 }
 0x7dc   : > { %2643 = vst [vmem:[%s4675_s26 + $0x28] sm:$0xff] %v2635_v49 }
 0x7dd   : > { %4108 = shalt.err (!%p4105_p0)
}
 0x7de   : > { %s4109_s5 = scalar_lea.hbm %s4690_s18, 1024  ;;  %s4113_s14 = scalar_lea.hbm %s4813_s16, 2048 }
 0x7df   : > { %p4110_p6 = scmp.ne.s32.totalorder %s4690_s18, %s4109_s5  ;;  %p4114_p9 = scmp.lt.s32.totalorder %s4690_s18, %s4813_s16 }
 0x7e0   : > { %p4115_p7 = scmp.lt.s32.totalorder %s4113_s14, %s4109_s5 }
 0x7e1   : > { %p4111_p13 = pnand %p4110_p6, %p4464_p4 }
 0x7e2   : > { %p4116_p1 = por %p4115_p7, %p4114_p9 }
 0x7e3   : > { %p4112_p12 = pneg %p4111_p13 }
 0x7e5   : > { %p4117_p3 = pnand %p4116_p1, %p4112_p12 }
 0x7e7   : > { %4120 = shalt.err (!%p4117_p3)
}
 0x7e8   : > { %s4214_s12 = smov 128   ;;  %s4215_s15 = smov 8  }
 0x7e9   : > { %3591 = dma.vmem_to_hbm [thread:$0]  (%p4464_p4), %s4684_s30, 1024, %s4690_s18, %s2647_s17, %s4214_s12, %s4214_s12, %s4215_s15  }
 0x7ea PF: > { %s4815_s29 = sld [smem:[#allocation32_spill]]  ;;  %s2677_s1 = sand.u32 1, %s4179_s24  }
 0x7eb   : > { %s2678_s21 = scalar_lea.sflag [#allocation6], %s2677_s1 }
 0x7f0   : > { %p4816_p2 = scmp.ge.s32.totalorder %s4815_s29, 2 }
 0x7f2   : > { %p3626_p8 = pnand %p4816_p2, %p4471_p10 }
 0x7f4   : > { %p3627_p11 = pneg %p3626_p8 }
 0x7f6   : > { %4174 = dma.done.wait (%p3627_p11), %s2678_s21, 1024  }
 0x7f7   : > { %4176 = vsyncadd (%p3627_p11), %s2678_s21, 4294966272  ;;  %s40_s29 = sadd.s32 1, %s4815_s29   ;;  %s4817_s0 = sld [smem:[#allocation30_spill]] }
 0x7f8   : > { %p37_p5 = scmp.ge.s32.totalorder %s40_s29, 4   ;;  %s4818_s26 = sld [smem:[#allocation34_spill]] }
 0x7f9   : > { %s4819_s19 = sld [smem:[#allocation33_spill]]  ;;  %s4820_s24 = smov %s4183_s25 }
 0x7fa   : > { %s4822_s27 = smov %s4195_s28 }
 0x7fb   :  { %39 = sbr.rel (!%p37_p5) target bundleno = 27 (0x1b), region = 182 }
 0x7fd   : > { %s4821_s25 = smov %s4817_s0 }
 0x7ff   : > { %s4823_s28 = smov %s4819_s19 }
 0x800   :  { %2683 = vsyncpa [#allocation5], 1 }
 0x801   :  { %2685 = vsyncpa [#allocation5 + $0x1], 1 }
 0x802   :  { %2686 = vsyncpa [#allocation8], 1 }
 0x803   :  { %2688 = vsyncpa [#allocation8 + $0x1], 1 }
 0x804   :  { %2689 = vsyncpa [#allocation11], 1 }
 0x805   :  { %2690 = vsyncpa [#allocation14], 1 }
 0x806   :  { %2691 = vsyncpa [#allocation17], 1 }
 0x807   :  { %2692 = vsyncpa [#allocation20], 1 }
 0x808   :  { %2693 = vsyncpa [#allocation6], 1 }
 0x809   :  { %2695 = vsyncpa [#allocation6 + $0x1], 1 }

</bundles_post_ra>
